<compile_context>
chip_gen: v6e
topology: v6e:2x2x1
jax: 0.10.0
libtpu: 0.0.40
codegen_flags: <defaults>
</compile_context>

<pallas_src>
import functools

import jax
import jax.numpy as jnp
import numpy as np
from jax.experimental import pallas as pl
from jax.experimental.pallas import tpu as pltpu


# ----------------------------------------------------------------------------
# Fused kernel: channel mean/max -> KxK "same" conv (zero pad) -> sigmoid.
# One grid step == one batch element; whole image resident in VMEM.
# ----------------------------------------------------------------------------
def _sam_kernel(w_ref, x_ref, o_ref, pad_ref, *, C, H, W, K):
    P = K // 2

    # Zero the halo scratch (border must be zero; interior is overwritten below).
    # Tiny relative to the 2*K*K-tap conv, and keeps each grid step self-contained
    # (safe under megacore "parallel" splitting of the batch axis).
    pad_ref[...] = jnp.zeros(pad_ref.shape, pad_ref.dtype)

    x = x_ref[0].astype(jnp.float32)                        # (C, H, W); W on lanes.
    # Channel reductions are over the leading (non-lane) axis: C-1 elementwise
    # adds / maxes over (H, W) vregs on the VPU.
    pad_ref[0, P:P + H, P:P + W] = jnp.mean(x, axis=0)      # avg over channels
    pad_ref[1, P:P + H, P:P + W] = jnp.max(x, axis=0)       # max over channels

    # 2 * K * K scalar-weighted shifted adds on the VPU; weights are scalar SMEM reads.
    acc = jnp.zeros((H, W), jnp.float32)
    for c in range(2):
        base = c * K * K
        for dy in range(K):
            for dx in range(K):
                wgt = w_ref[base + dy * K + dx]             # scalar from SMEM
                acc = acc + wgt * pad_ref[c, dy:dy + H, dx:dx + W]

    o_ref[0, 0] = jax.nn.sigmoid(acc).astype(o_ref.dtype)


def spatial_attention(x, w):
    """x: (N, C, H, W) float32.  w: (1, 2, K, K) PyTorch-layout conv weight (bias=False).

    Returns sigmoid(conv_KxK(cat([mean_C(x), max_C(x)], 1))) of shape (N, 1, H, W).
    """
    N, C, H, W = x.shape
    K = w.shape[-1]
    P = K // 2

    # Flatten weight to (2*K*K,) in (c, dy, dx) order; lives in SMEM (scalar reads).
    w_flat = jnp.asarray(w, jnp.float32).reshape(-1)

    kernel = functools.partial(_sam_kernel, C=C, H=H, W=W, K=K)

    return pl.pallas_call(
        kernel,
        out_shape=jax.ShapeDtypeStruct((N, 1, H, W), jnp.float32),
        grid=(N,),
        in_specs=[
            pl.BlockSpec(memory_space=pltpu.MemorySpace.SMEM),        # conv weights
            pl.BlockSpec((1, C, H, W), lambda n: (n, 0, 0, 0)),       # x (per batch)
        ],
        out_specs=pl.BlockSpec((1, 1, H, W), lambda n: (n, 0, 0, 0)),
        scratch_shapes=[pltpu.VMEM((2, H + 2 * P, W + 2 * P), jnp.float32)],
        compiler_params=pltpu.CompilerParams(dimension_semantics=("parallel",)),
    )(w_flat, x.astype(jnp.float32))


# ----------------------------------------------------------------------------
# Self-test
# ----------------------------------------------------------------------------
if __name__ == "__main__":
    key = jax.random.PRNGKey(0)
    kx, kw = jax.random.split(key)

    N, C, H, W, K = 2, 4, 16, 16, 7
    x = jax.random.uniform(kx, (N, C, H, W), jnp.float32)
    w = 0.1 * jax.random.normal(kw, (1, 2, K, K), jnp.float32)   # Conv2d(2,1,7,bias=False)

    out = jax.jit(spatial_attention)(x, w)
    jax.block_until_ready(out)
    assert out.shape == (N, 1, H, W)

    # Pure-JAX reference (cross-correlation, zero padding, no bias) — same as PyTorch.
    avg = jnp.mean(x, axis=1, keepdims=True)
    mx = jnp.max(x, axis=1, keepdims=True)
    cat = jnp.concatenate([avg, mx], axis=1)
    ref = jax.nn.sigmoid(jax.lax.conv_general_dilated(
        cat, w, window_strides=(1, 1),
        padding=[(K // 2, K // 2), (K // 2, K // 2)],
        dimension_numbers=("NCHW", "OIHW", "NCHW")))

    np.testing.assert_allclose(np.asarray(out), np.asarray(ref), atol=1e-5, rtol=1e-5)
    print("KERNEL_OK")
</pallas_src>

<mosaic_0001>
module attributes {stable_mosaic.version = 11 : i64} {
  func.func @_sam_kernel(%arg0: i32, %arg1: memref<98xf32, #tpu.memory_space<smem>>, %arg2: memref<1x4x16x16xf32, #tpu.memory_space<vmem>>, %arg3: memref<1x1x16x16xf32, #tpu.memory_space<vmem>>, %arg4: memref<2x22x22xf32, #tpu.memory_space<vmem>>) attributes {dimension_semantics = [#tpu.dimension_semantics<parallel>], iteration_bounds = array<i64: 2>, scalar_prefetch = 0 : i64, scratch_operands = 1 : i64, tpu.core_type = #tpu.core_type<tc>, window_params = [{transform_indices = @transform_0, window_bounds = array<i64: 98>}, {transform_indices = @transform_1, window_bounds = array<i64: 1, 4, 16, 16>}, {transform_indices = @transform_2, window_bounds = array<i64: 1, 1, 16, 16>}]} {
    %cst = arith.constant 0.000000e+00 : f32
    %0 = vector.broadcast %cst : f32 to vector<2x22x22xf32>
    %c0 = arith.constant 0 : index
    %c0_0 = arith.constant 0 : index
    %c0_1 = arith.constant 0 : index
    %1 = vector.load %arg4[%c0, %c0_0, %c0_1] : memref<2x22x22xf32, #tpu.memory_space<vmem>>, vector<2x22x22xf32>
    tpu.vector_store %arg4[%c0, %c0_0, %c0_1], %0 {strides = array<i32>} : memref<2x22x22xf32, #tpu.memory_space<vmem>>, vector<2x22x22xf32>,
    %c0_2 = arith.constant 0 : index
    %c0_3 = arith.constant 0 : index
    %c0_4 = arith.constant 0 : index
    %c0_5 = arith.constant 0 : index
    %2 = vector.load %arg2[%c0_2, %c0_3, %c0_4, %c0_5] : memref<1x4x16x16xf32, #tpu.memory_space<vmem>>, vector<1x4x16x16xf32>
    %3 = vector.shape_cast %2 : vector<1x4x16x16xf32> to vector<4x16x16xf32>
    %cst_6 = arith.constant dense<0.000000e+00> : vector<16x16xf32>
    %4 = vector.multi_reduction <add>, %3, %cst_6 [0] : vector<4x16x16xf32> to vector<16x16xf32>
    %cst_7 = arith.constant 4.000000e+00 : f32
    %5 = vector.broadcast %cst_7 : f32 to vector<16x16xf32>
    %6 = arith.divf %4, %5 : vector<16x16xf32>
    %c0_8 = arith.constant 0 : index
    %c3 = arith.constant 3 : index
    %c3_9 = arith.constant 3 : index
    %7 = vector.load %arg4[%c0_8, %c3, %c3_9] : memref<2x22x22xf32, #tpu.memory_space<vmem>>, vector<1x16x16xf32>
    %8 = vector.shape_cast %7 : vector<1x16x16xf32> to vector<16x16xf32>
    %9 = vector.shape_cast %6 : vector<16x16xf32> to vector<1x16x16xf32>
    tpu.vector_store %arg4[%c0_8, %c3, %c3_9], %9 {strides = array<i32>} : memref<2x22x22xf32, #tpu.memory_space<vmem>>, vector<1x16x16xf32>,
    %cst_10 = arith.constant dense<0xFF800000> : vector<16x16xf32>
    %10 = vector.multi_reduction <maximumf>, %3, %cst_10 [0] : vector<4x16x16xf32> to vector<16x16xf32>
    %c1 = arith.constant 1 : index
    %c3_11 = arith.constant 3 : index
    %c3_12 = arith.constant 3 : index
    %11 = vector.load %arg4[%c1, %c3_11, %c3_12] : memref<2x22x22xf32, #tpu.memory_space<vmem>>, vector<1x16x16xf32>
    %12 = vector.shape_cast %11 : vector<1x16x16xf32> to vector<16x16xf32>
    %13 = vector.shape_cast %10 : vector<16x16xf32> to vector<1x16x16xf32>
    tpu.vector_store %arg4[%c1, %c3_11, %c3_12], %13 {strides = array<i32>} : memref<2x22x22xf32, #tpu.memory_space<vmem>>, vector<1x16x16xf32>,
    %cst_13 = arith.constant 0.000000e+00 : f32
    %14 = vector.broadcast %cst_13 : f32 to vector<16x16xf32>
    %c0_14 = arith.constant 0 : index
    %15 = memref.load %arg1[%c0_14] : memref<98xf32, #tpu.memory_space<smem>>
    %c0_15 = arith.constant 0 : index
    %c0_16 = arith.constant 0 : index
    %c0_17 = arith.constant 0 : index
    %16 = vector.load %arg4[%c0_15, %c0_16, %c0_17] : memref<2x22x22xf32, #tpu.memory_space<vmem>>, vector<1x16x16xf32>
    %17 = vector.shape_cast %16 : vector<1x16x16xf32> to vector<16x16xf32>
    %18 = vector.broadcast %15 : f32 to vector<16x16xf32>
    %19 = arith.mulf %18, %17 : vector<16x16xf32>
    %20 = arith.addf %14, %19 : vector<16x16xf32>
    %c1_18 = arith.constant 1 : index
    %21 = memref.load %arg1[%c1_18] : memref<98xf32, #tpu.memory_space<smem>>
    %c0_19 = arith.constant 0 : index
    %c0_20 = arith.constant 0 : index
    %c1_21 = arith.constant 1 : index
    %22 = vector.load %arg4[%c0_19, %c0_20, %c1_21] : memref<2x22x22xf32, #tpu.memory_space<vmem>>, vector<1x16x16xf32>
    %23 = vector.shape_cast %22 : vector<1x16x16xf32> to vector<16x16xf32>
    %24 = vector.broadcast %21 : f32 to vector<16x16xf32>
    %25 = arith.mulf %24, %23 : vector<16x16xf32>
    %26 = arith.addf %20, %25 : vector<16x16xf32>
    %c2 = arith.constant 2 : index
    %27 = memref.load %arg1[%c2] : memref<98xf32, #tpu.memory_space<smem>>
    %c0_22 = arith.constant 0 : index
    %c0_23 = arith.constant 0 : index
    %c2_24 = arith.constant 2 : index
    %28 = vector.load %arg4[%c0_22, %c0_23, %c2_24] : memref<2x22x22xf32, #tpu.memory_space<vmem>>, vector<1x16x16xf32>
    %29 = vector.shape_cast %28 : vector<1x16x16xf32> to vector<16x16xf32>
    %30 = vector.broadcast %27 : f32 to vector<16x16xf32>
    %31 = arith.mulf %30, %29 : vector<16x16xf32>
    %32 = arith.addf %26, %31 : vector<16x16xf32>
    %c3_25 = arith.constant 3 : index
    %33 = memref.load %arg1[%c3_25] : memref<98xf32, #tpu.memory_space<smem>>
    %c0_26 = arith.constant 0 : index
    %c0_27 = arith.constant 0 : index
    %c3_28 = arith.constant 3 : index
    %34 = vector.load %arg4[%c0_26, %c0_27, %c3_28] : memref<2x22x22xf32, #tpu.memory_space<vmem>>, vector<1x16x16xf32>
    %35 = vector.shape_cast %34 : vector<1x16x16xf32> to vector<16x16xf32>
    %36 = vector.broadcast %33 : f32 to vector<16x16xf32>
    %37 = arith.mulf %36, %35 : vector<16x16xf32>
    %38 = arith.addf %32, %37 : vector<16x16xf32>
    %c4 = arith.constant 4 : index
    %39 = memref.load %arg1[%c4] : memref<98xf32, #tpu.memory_space<smem>>
    %c0_29 = arith.constant 0 : index
    %c0_30 = arith.constant 0 : index
    %c4_31 = arith.constant 4 : index
    %40 = vector.load %arg4[%c0_29, %c0_30, %c4_31] : memref<2x22x22xf32, #tpu.memory_space<vmem>>, vector<1x16x16xf32>
    %41 = vector.shape_cast %40 : vector<1x16x16xf32> to vector<16x16xf32>
    %42 = vector.broadcast %39 : f32 to vector<16x16xf32>
    %43 = arith.mulf %42, %41 : vector<16x16xf32>
    %44 = arith.addf %38, %43 : vector<16x16xf32>
    %c5 = arith.constant 5 : index
    %45 = memref.load %arg1[%c5] : memref<98xf32, #tpu.memory_space<smem>>
    %c0_32 = arith.constant 0 : index
    %c0_33 = arith.constant 0 : index
    %c5_34 = arith.constant 5 : index
    %46 = vector.load %arg4[%c0_32, %c0_33, %c5_34] : memref<2x22x22xf32, #tpu.memory_space<vmem>>, vector<1x16x16xf32>
    %47 = vector.shape_cast %46 : vector<1x16x16xf32> to vector<16x16xf32>
    %48 = vector.broadcast %45 : f32 to vector<16x16xf32>
    %49 = arith.mulf %48, %47 : vector<16x16xf32>
    %50 = arith.addf %44, %49 : vector<16x16xf32>
    %c6 = arith.constant 6 : index
    %51 = memref.load %arg1[%c6] : memref<98xf32, #tpu.memory_space<smem>>
    %c0_35 = arith.constant 0 : index
    %c0_36 = arith.constant 0 : index
    %c6_37 = arith.constant 6 : index
    %52 = vector.load %arg4[%c0_35, %c0_36, %c6_37] : memref<2x22x22xf32, #tpu.memory_space<vmem>>, vector<1x16x16xf32>
    %53 = vector.shape_cast %52 : vector<1x16x16xf32> to vector<16x16xf32>
    %54 = vector.broadcast %51 : f32 to vector<16x16xf32>
    %55 = arith.mulf %54, %53 : vector<16x16xf32>
    %56 = arith.addf %50, %55 : vector<16x16xf32>
    %c7 = arith.constant 7 : index
    %57 = memref.load %arg1[%c7] : memref<98xf32, #tpu.memory_space<smem>>
    %c0_38 = arith.constant 0 : index
    %c1_39 = arith.constant 1 : index
    %c0_40 = arith.constant 0 : index
    %58 = vector.load %arg4[%c0_38, %c1_39, %c0_40] : memref<2x22x22xf32, #tpu.memory_space<vmem>>, vector<1x16x16xf32>
    %59 = vector.shape_cast %58 : vector<1x16x16xf32> to vector<16x16xf32>
    %60 = vector.broadcast %57 : f32 to vector<16x16xf32>
    %61 = arith.mulf %60, %59 : vector<16x16xf32>
    %62 = arith.addf %56, %61 : vector<16x16xf32>
    %c8 = arith.constant 8 : index
    %63 = memref.load %arg1[%c8] : memref<98xf32, #tpu.memory_space<smem>>
    %c0_41 = arith.constant 0 : index
    %c1_42 = arith.constant 1 : index
    %c1_43 = arith.constant 1 : index
    %64 = vector.load %arg4[%c0_41, %c1_42, %c1_43] : memref<2x22x22xf32, #tpu.memory_space<vmem>>, vector<1x16x16xf32>
    %65 = vector.shape_cast %64 : vector<1x16x16xf32> to vector<16x16xf32>
    %66 = vector.broadcast %63 : f32 to vector<16x16xf32>
    %67 = arith.mulf %66, %65 : vector<16x16xf32>
    %68 = arith.addf %62, %67 : vector<16x16xf32>
    %c9 = arith.constant 9 : index
    %69 = memref.load %arg1[%c9] : memref<98xf32, #tpu.memory_space<smem>>
    %c0_44 = arith.constant 0 : index
    %c1_45 = arith.constant 1 : index
    %c2_46 = arith.constant 2 : index
    %70 = vector.load %arg4[%c0_44, %c1_45, %c2_46] : memref<2x22x22xf32, #tpu.memory_space<vmem>>, vector<1x16x16xf32>
    %71 = vector.shape_cast %70 : vector<1x16x16xf32> to vector<16x16xf32>
    %72 = vector.broadcast %69 : f32 to vector<16x16xf32>
    %73 = arith.mulf %72, %71 : vector<16x16xf32>
    %74 = arith.addf %68, %73 : vector<16x16xf32>
    %c10 = arith.constant 10 : index
    %75 = memref.load %arg1[%c10] : memref<98xf32, #tpu.memory_space<smem>>
    %c0_47 = arith.constant 0 : index
    %c1_48 = arith.constant 1 : index
    %c3_49 = arith.constant 3 : index
    %76 = vector.load %arg4[%c0_47, %c1_48, %c3_49] : memref<2x22x22xf32, #tpu.memory_space<vmem>>, vector<1x16x16xf32>
    %77 = vector.shape_cast %76 : vector<1x16x16xf32> to vector<16x16xf32>
    %78 = vector.broadcast %75 : f32 to vector<16x16xf32>
    %79 = arith.mulf %78, %77 : vector<16x16xf32>
    %80 = arith.addf %74, %79 : vector<16x16xf32>
    %c11 = arith.constant 11 : index
    %81 = memref.load %arg1[%c11] : memref<98xf32, #tpu.memory_space<smem>>
    %c0_50 = arith.constant 0 : index
    %c1_51 = arith.constant 1 : index
    %c4_52 = arith.constant 4 : index
    %82 = vector.load %arg4[%c0_50, %c1_51, %c4_52] : memref<2x22x22xf32, #tpu.memory_space<vmem>>, vector<1x16x16xf32>
    %83 = vector.shape_cast %82 : vector<1x16x16xf32> to vector<16x16xf32>
    %84 = vector.broadcast %81 : f32 to vector<16x16xf32>
    %85 = arith.mulf %84, %83 : vector<16x16xf32>
    %86 = arith.addf %80, %85 : vector<16x16xf32>
    %c12 = arith.constant 12 : index
    %87 = memref.load %arg1[%c12] : memref<98xf32, #tpu.memory_space<smem>>
    %c0_53 = arith.constant 0 : index
    %c1_54 = arith.constant 1 : index
    %c5_55 = arith.constant 5 : index
    %88 = vector.load %arg4[%c0_53, %c1_54, %c5_55] : memref<2x22x22xf32, #tpu.memory_space<vmem>>, vector<1x16x16xf32>
    %89 = vector.shape_cast %88 : vector<1x16x16xf32> to vector<16x16xf32>
    %90 = vector.broadcast %87 : f32 to vector<16x16xf32>
    %91 = arith.mulf %90, %89 : vector<16x16xf32>
    %92 = arith.addf %86, %91 : vector<16x16xf32>
    %c13 = arith.constant 13 : index
    %93 = memref.load %arg1[%c13] : memref<98xf32, #tpu.memory_space<smem>>
    %c0_56 = arith.constant 0 : index
    %c1_57 = arith.constant 1 : index
    %c6_58 = arith.constant 6 : index
    %94 = vector.load %arg4[%c0_56, %c1_57, %c6_58] : memref<2x22x22xf32, #tpu.memory_space<vmem>>, vector<1x16x16xf32>
    %95 = vector.shape_cast %94 : vector<1x16x16xf32> to vector<16x16xf32>
    %96 = vector.broadcast %93 : f32 to vector<16x16xf32>
    %97 = arith.mulf %96, %95 : vector<16x16xf32>
    %98 = arith.addf %92, %97 : vector<16x16xf32>
    %c14 = arith.constant 14 : index
    %99 = memref.load %arg1[%c14] : memref<98xf32, #tpu.memory_space<smem>>
    %c0_59 = arith.constant 0 : index
    %c2_60 = arith.constant 2 : index
    %c0_61 = arith.constant 0 : index
    %100 = vector.load %arg4[%c0_59, %c2_60, %c0_61] : memref<2x22x22xf32, #tpu.memory_space<vmem>>, vector<1x16x16xf32>
    %101 = vector.shape_cast %100 : vector<1x16x16xf32> to vector<16x16xf32>
    %102 = vector.broadcast %99 : f32 to vector<16x16xf32>
    %103 = arith.mulf %102, %101 : vector<16x16xf32>
    %104 = arith.addf %98, %103 : vector<16x16xf32>
    %c15 = arith.constant 15 : index
    %105 = memref.load %arg1[%c15] : memref<98xf32, #tpu.memory_space<smem>>
    %c0_62 = arith.constant 0 : index
    %c2_63 = arith.constant 2 : index
    %c1_64 = arith.constant 1 : index
    %106 = vector.load %arg4[%c0_62, %c2_63, %c1_64] : memref<2x22x22xf32, #tpu.memory_space<vmem>>, vector<1x16x16xf32>
    %107 = vector.shape_cast %106 : vector<1x16x16xf32> to vector<16x16xf32>
    %108 = vector.broadcast %105 : f32 to vector<16x16xf32>
    %109 = arith.mulf %108, %107 : vector<16x16xf32>
    %110 = arith.addf %104, %109 : vector<16x16xf32>
    %c16 = arith.constant 16 : index
    %111 = memref.load %arg1[%c16] : memref<98xf32, #tpu.memory_space<smem>>
    %c0_65 = arith.constant 0 : index
    %c2_66 = arith.constant 2 : index
    %c2_67 = arith.constant 2 : index
    %112 = vector.load %arg4[%c0_65, %c2_66, %c2_67] : memref<2x22x22xf32, #tpu.memory_space<vmem>>, vector<1x16x16xf32>
    %113 = vector.shape_cast %112 : vector<1x16x16xf32> to vector<16x16xf32>
    %114 = vector.broadcast %111 : f32 to vector<16x16xf32>
    %115 = arith.mulf %114, %113 : vector<16x16xf32>
    %116 = arith.addf %110, %115 : vector<16x16xf32>
    %c17 = arith.constant 17 : index
    %117 = memref.load %arg1[%c17] : memref<98xf32, #tpu.memory_space<smem>>
    %c0_68 = arith.constant 0 : index
    %c2_69 = arith.constant 2 : index
    %c3_70 = arith.constant 3 : index
    %118 = vector.load %arg4[%c0_68, %c2_69, %c3_70] : memref<2x22x22xf32, #tpu.memory_space<vmem>>, vector<1x16x16xf32>
    %119 = vector.shape_cast %118 : vector<1x16x16xf32> to vector<16x16xf32>
    %120 = vector.broadcast %117 : f32 to vector<16x16xf32>
    %121 = arith.mulf %120, %119 : vector<16x16xf32>
    %122 = arith.addf %116, %121 : vector<16x16xf32>
    %c18 = arith.constant 18 : index
    %123 = memref.load %arg1[%c18] : memref<98xf32, #tpu.memory_space<smem>>
    %c0_71 = arith.constant 0 : index
    %c2_72 = arith.constant 2 : index
    %c4_73 = arith.constant 4 : index
    %124 = vector.load %arg4[%c0_71, %c2_72, %c4_73] : memref<2x22x22xf32, #tpu.memory_space<vmem>>, vector<1x16x16xf32>
    %125 = vector.shape_cast %124 : vector<1x16x16xf32> to vector<16x16xf32>
    %126 = vector.broadcast %123 : f32 to vector<16x16xf32>
    %127 = arith.mulf %126, %125 : vector<16x16xf32>
    %128 = arith.addf %122, %127 : vector<16x16xf32>
    %c19 = arith.constant 19 : index
    %129 = memref.load %arg1[%c19] : memref<98xf32, #tpu.memory_space<smem>>
    %c0_74 = arith.constant 0 : index
    %c2_75 = arith.constant 2 : index
    %c5_76 = arith.constant 5 : index
    %130 = vector.load %arg4[%c0_74, %c2_75, %c5_76] : memref<2x22x22xf32, #tpu.memory_space<vmem>>, vector<1x16x16xf32>
    %131 = vector.shape_cast %130 : vector<1x16x16xf32> to vector<16x16xf32>
    %132 = vector.broadcast %129 : f32 to vector<16x16xf32>
    %133 = arith.mulf %132, %131 : vector<16x16xf32>
    %134 = arith.addf %128, %133 : vector<16x16xf32>
    %c20 = arith.constant 20 : index
    %135 = memref.load %arg1[%c20] : memref<98xf32, #tpu.memory_space<smem>>
    %c0_77 = arith.constant 0 : index
    %c2_78 = arith.constant 2 : index
    %c6_79 = arith.constant 6 : index
    %136 = vector.load %arg4[%c0_77, %c2_78, %c6_79] : memref<2x22x22xf32, #tpu.memory_space<vmem>>, vector<1x16x16xf32>
    %137 = vector.shape_cast %136 : vector<1x16x16xf32> to vector<16x16xf32>
    %138 = vector.broadcast %135 : f32 to vector<16x16xf32>
    %139 = arith.mulf %138, %137 : vector<16x16xf32>
    %140 = arith.addf %134, %139 : vector<16x16xf32>
    %c21 = arith.constant 21 : index
    %141 = memref.load %arg1[%c21] : memref<98xf32, #tpu.memory_space<smem>>
    %c0_80 = arith.constant 0 : index
    %c3_81 = arith.constant 3 : index
    %c0_82 = arith.constant 0 : index
    %142 = vector.load %arg4[%c0_80, %c3_81, %c0_82] : memref<2x22x22xf32, #tpu.memory_space<vmem>>, vector<1x16x16xf32>
    %143 = vector.shape_cast %142 : vector<1x16x16xf32> to vector<16x16xf32>
    %144 = vector.broadcast %141 : f32 to vector<16x16xf32>
    %145 = arith.mulf %144, %143 : vector<16x16xf32>
    %146 = arith.addf %140, %145 : vector<16x16xf32>
    %c22 = arith.constant 22 : index
    %147 = memref.load %arg1[%c22] : memref<98xf32, #tpu.memory_space<smem>>
    %c0_83 = arith.constant 0 : index
    %c3_84 = arith.constant 3 : index
    %c1_85 = arith.constant 1 : index
    %148 = vector.load %arg4[%c0_83, %c3_84, %c1_85] : memref<2x22x22xf32, #tpu.memory_space<vmem>>, vector<1x16x16xf32>
    %149 = vector.shape_cast %148 : vector<1x16x16xf32> to vector<16x16xf32>
    %150 = vector.broadcast %147 : f32 to vector<16x16xf32>
    %151 = arith.mulf %150, %149 : vector<16x16xf32>
    %152 = arith.addf %146, %151 : vector<16x16xf32>
    %c23 = arith.constant 23 : index
    %153 = memref.load %arg1[%c23] : memref<98xf32, #tpu.memory_space<smem>>
    %c0_86 = arith.constant 0 : index
    %c3_87 = arith.constant 3 : index
    %c2_88 = arith.constant 2 : index
    %154 = vector.load %arg4[%c0_86, %c3_87, %c2_88] : memref<2x22x22xf32, #tpu.memory_space<vmem>>, vector<1x16x16xf32>
    %155 = vector.shape_cast %154 : vector<1x16x16xf32> to vector<16x16xf32>
    %156 = vector.broadcast %153 : f32 to vector<16x16xf32>
    %157 = arith.mulf %156, %155 : vector<16x16xf32>
    %158 = arith.addf %152, %157 : vector<16x16xf32>
    %c24 = arith.constant 24 : index
    %159 = memref.load %arg1[%c24] : memref<98xf32, #tpu.memory_space<smem>>
    %c0_89 = arith.constant 0 : index
    %c3_90 = arith.constant 3 : index
    %c3_91 = arith.constant 3 : index
    %160 = vector.load %arg4[%c0_89, %c3_90, %c3_91] : memref<2x22x22xf32, #tpu.memory_space<vmem>>, vector<1x16x16xf32>
    %161 = vector.shape_cast %160 : vector<1x16x16xf32> to vector<16x16xf32>
    %162 = vector.broadcast %159 : f32 to vector<16x16xf32>
    %163 = arith.mulf %162, %161 : vector<16x16xf32>
    %164 = arith.addf %158, %163 : vector<16x16xf32>
    %c25 = arith.constant 25 : index
    %165 = memref.load %arg1[%c25] : memref<98xf32, #tpu.memory_space<smem>>
    %c0_92 = arith.constant 0 : index
    %c3_93 = arith.constant 3 : index
    %c4_94 = arith.constant 4 : index
    %166 = vector.load %arg4[%c0_92, %c3_93, %c4_94] : memref<2x22x22xf32, #tpu.memory_space<vmem>>, vector<1x16x16xf32>
    %167 = vector.shape_cast %166 : vector<1x16x16xf32> to vector<16x16xf32>
    %168 = vector.broadcast %165 : f32 to vector<16x16xf32>
    %169 = arith.mulf %168, %167 : vector<16x16xf32>
    %170 = arith.addf %164, %169 : vector<16x16xf32>
    %c26 = arith.constant 26 : index
    %171 = memref.load %arg1[%c26] : memref<98xf32, #tpu.memory_space<smem>>
    %c0_95 = arith.constant 0 : index
    %c3_96 = arith.constant 3 : index
    %c5_97 = arith.constant 5 : index
    %172 = vector.load %arg4[%c0_95, %c3_96, %c5_97] : memref<2x22x22xf32, #tpu.memory_space<vmem>>, vector<1x16x16xf32>
    %173 = vector.shape_cast %172 : vector<1x16x16xf32> to vector<16x16xf32>
    %174 = vector.broadcast %171 : f32 to vector<16x16xf32>
    %175 = arith.mulf %174, %173 : vector<16x16xf32>
    %176 = arith.addf %170, %175 : vector<16x16xf32>
    %c27 = arith.constant 27 : index
    %177 = memref.load %arg1[%c27] : memref<98xf32, #tpu.memory_space<smem>>
    %c0_98 = arith.constant 0 : index
    %c3_99 = arith.constant 3 : index
    %c6_100 = arith.constant 6 : index
    %178 = vector.load %arg4[%c0_98, %c3_99, %c6_100] : memref<2x22x22xf32, #tpu.memory_space<vmem>>, vector<1x16x16xf32>
    %179 = vector.shape_cast %178 : vector<1x16x16xf32> to vector<16x16xf32>
    %180 = vector.broadcast %177 : f32 to vector<16x16xf32>
    %181 = arith.mulf %180, %179 : vector<16x16xf32>
    %182 = arith.addf %176, %181 : vector<16x16xf32>
    %c28 = arith.constant 28 : index
    %183 = memref.load %arg1[%c28] : memref<98xf32, #tpu.memory_space<smem>>
    %c0_101 = arith.constant 0 : index
    %c4_102 = arith.constant 4 : index
    %c0_103 = arith.constant 0 : index
    %184 = vector.load %arg4[%c0_101, %c4_102, %c0_103] : memref<2x22x22xf32, #tpu.memory_space<vmem>>, vector<1x16x16xf32>
    %185 = vector.shape_cast %184 : vector<1x16x16xf32> to vector<16x16xf32>
    %186 = vector.broadcast %183 : f32 to vector<16x16xf32>
    %187 = arith.mulf %186, %185 : vector<16x16xf32>
    %188 = arith.addf %182, %187 : vector<16x16xf32>
    %c29 = arith.constant 29 : index
    %189 = memref.load %arg1[%c29] : memref<98xf32, #tpu.memory_space<smem>>
    %c0_104 = arith.constant 0 : index
    %c4_105 = arith.constant 4 : index
    %c1_106 = arith.constant 1 : index
    %190 = vector.load %arg4[%c0_104, %c4_105, %c1_106] : memref<2x22x22xf32, #tpu.memory_space<vmem>>, vector<1x16x16xf32>
    %191 = vector.shape_cast %190 : vector<1x16x16xf32> to vector<16x16xf32>
    %192 = vector.broadcast %189 : f32 to vector<16x16xf32>
    %193 = arith.mulf %192, %191 : vector<16x16xf32>
    %194 = arith.addf %188, %193 : vector<16x16xf32>
    %c30 = arith.constant 30 : index
    %195 = memref.load %arg1[%c30] : memref<98xf32, #tpu.memory_space<smem>>
    %c0_107 = arith.constant 0 : index
    %c4_108 = arith.constant 4 : index
    %c2_109 = arith.constant 2 : index
    %196 = vector.load %arg4[%c0_107, %c4_108, %c2_109] : memref<2x22x22xf32, #tpu.memory_space<vmem>>, vector<1x16x16xf32>
    %197 = vector.shape_cast %196 : vector<1x16x16xf32> to vector<16x16xf32>
    %198 = vector.broadcast %195 : f32 to vector<16x16xf32>
    %199 = arith.mulf %198, %197 : vector<16x16xf32>
    %200 = arith.addf %194, %199 : vector<16x16xf32>
    %c31 = arith.constant 31 : index
    %201 = memref.load %arg1[%c31] : memref<98xf32, #tpu.memory_space<smem>>
    %c0_110 = arith.constant 0 : index
    %c4_111 = arith.constant 4 : index
    %c3_112 = arith.constant 3 : index
    %202 = vector.load %arg4[%c0_110, %c4_111, %c3_112] : memref<2x22x22xf32, #tpu.memory_space<vmem>>, vector<1x16x16xf32>
    %203 = vector.shape_cast %202 : vector<1x16x16xf32> to vector<16x16xf32>
    %204 = vector.broadcast %201 : f32 to vector<16x16xf32>
    %205 = arith.mulf %204, %203 : vector<16x16xf32>
    %206 = arith.addf %200, %205 : vector<16x16xf32>
    %c32 = arith.constant 32 : index
    %207 = memref.load %arg1[%c32] : memref<98xf32, #tpu.memory_space<smem>>
    %c0_113 = arith.constant 0 : index
    %c4_114 = arith.constant 4 : index
    %c4_115 = arith.constant 4 : index
    %208 = vector.load %arg4[%c0_113, %c4_114, %c4_115] : memref<2x22x22xf32, #tpu.memory_space<vmem>>, vector<1x16x16xf32>
    %209 = vector.shape_cast %208 : vector<1x16x16xf32> to vector<16x16xf32>
    %210 = vector.broadcast %207 : f32 to vector<16x16xf32>
    %211 = arith.mulf %210, %209 : vector<16x16xf32>
    %212 = arith.addf %206, %211 : vector<16x16xf32>
    %c33 = arith.constant 33 : index
    %213 = memref.load %arg1[%c33] : memref<98xf32, #tpu.memory_space<smem>>
    %c0_116 = arith.constant 0 : index
    %c4_117 = arith.constant 4 : index
    %c5_118 = arith.constant 5 : index
    %214 = vector.load %arg4[%c0_116, %c4_117, %c5_118] : memref<2x22x22xf32, #tpu.memory_space<vmem>>, vector<1x16x16xf32>
    %215 = vector.shape_cast %214 : vector<1x16x16xf32> to vector<16x16xf32>
    %216 = vector.broadcast %213 : f32 to vector<16x16xf32>
    %217 = arith.mulf %216, %215 : vector<16x16xf32>
    %218 = arith.addf %212, %217 : vector<16x16xf32>
    %c34 = arith.constant 34 : index
    %219 = memref.load %arg1[%c34] : memref<98xf32, #tpu.memory_space<smem>>
    %c0_119 = arith.constant 0 : index
    %c4_120 = arith.constant 4 : index
    %c6_121 = arith.constant 6 : index
    %220 = vector.load %arg4[%c0_119, %c4_120, %c6_121] : memref<2x22x22xf32, #tpu.memory_space<vmem>>, vector<1x16x16xf32>
    %221 = vector.shape_cast %220 : vector<1x16x16xf32> to vector<16x16xf32>
    %222 = vector.broadcast %219 : f32 to vector<16x16xf32>
    %223 = arith.mulf %222, %221 : vector<16x16xf32>
    %224 = arith.addf %218, %223 : vector<16x16xf32>
    %c35 = arith.constant 35 : index
    %225 = memref.load %arg1[%c35] : memref<98xf32, #tpu.memory_space<smem>>
    %c0_122 = arith.constant 0 : index
    %c5_123 = arith.constant 5 : index
    %c0_124 = arith.constant 0 : index
    %226 = vector.load %arg4[%c0_122, %c5_123, %c0_124] : memref<2x22x22xf32, #tpu.memory_space<vmem>>, vector<1x16x16xf32>
    %227 = vector.shape_cast %226 : vector<1x16x16xf32> to vector<16x16xf32>
    %228 = vector.broadcast %225 : f32 to vector<16x16xf32>
    %229 = arith.mulf %228, %227 : vector<16x16xf32>
    %230 = arith.addf %224, %229 : vector<16x16xf32>
    %c36 = arith.constant 36 : index
    %231 = memref.load %arg1[%c36] : memref<98xf32, #tpu.memory_space<smem>>
    %c0_125 = arith.constant 0 : index
    %c5_126 = arith.constant 5 : index
    %c1_127 = arith.constant 1 : index
    %232 = vector.load %arg4[%c0_125, %c5_126, %c1_127] : memref<2x22x22xf32, #tpu.memory_space<vmem>>, vector<1x16x16xf32>
    %233 = vector.shape_cast %232 : vector<1x16x16xf32> to vector<16x16xf32>
    %234 = vector.broadcast %231 : f32 to vector<16x16xf32>
    %235 = arith.mulf %234, %233 : vector<16x16xf32>
    %236 = arith.addf %230, %235 : vector<16x16xf32>
    %c37 = arith.constant 37 : index
    %237 = memref.load %arg1[%c37] : memref<98xf32, #tpu.memory_space<smem>>
    %c0_128 = arith.constant 0 : index
    %c5_129 = arith.constant 5 : index
    %c2_130 = arith.constant 2 : index
    %238 = vector.load %arg4[%c0_128, %c5_129, %c2_130] : memref<2x22x22xf32, #tpu.memory_space<vmem>>, vector<1x16x16xf32>
    %239 = vector.shape_cast %238 : vector<1x16x16xf32> to vector<16x16xf32>
    %240 = vector.broadcast %237 : f32 to vector<16x16xf32>
    %241 = arith.mulf %240, %239 : vector<16x16xf32>
    %242 = arith.addf %236, %241 : vector<16x16xf32>
    %c38 = arith.constant 38 : index
    %243 = memref.load %arg1[%c38] : memref<98xf32, #tpu.memory_space<smem>>
    %c0_131 = arith.constant 0 : index
    %c5_132 = arith.constant 5 : index
    %c3_133 = arith.constant 3 : index
    %244 = vector.load %arg4[%c0_131, %c5_132, %c3_133] : memref<2x22x22xf32, #tpu.memory_space<vmem>>, vector<1x16x16xf32>
    %245 = vector.shape_cast %244 : vector<1x16x16xf32> to vector<16x16xf32>
    %246 = vector.broadcast %243 : f32 to vector<16x16xf32>
    %247 = arith.mulf %246, %245 : vector<16x16xf32>
    %248 = arith.addf %242, %247 : vector<16x16xf32>
    %c39 = arith.constant 39 : index
    %249 = memref.load %arg1[%c39] : memref<98xf32, #tpu.memory_space<smem>>
    %c0_134 = arith.constant 0 : index
    %c5_135 = arith.constant 5 : index
    %c4_136 = arith.constant 4 : index
    %250 = vector.load %arg4[%c0_134, %c5_135, %c4_136] : memref<2x22x22xf32, #tpu.memory_space<vmem>>, vector<1x16x16xf32>
    %251 = vector.shape_cast %250 : vector<1x16x16xf32> to vector<16x16xf32>
    %252 = vector.broadcast %249 : f32 to vector<16x16xf32>
    %253 = arith.mulf %252, %251 : vector<16x16xf32>
    %254 = arith.addf %248, %253 : vector<16x16xf32>
    %c40 = arith.constant 40 : index
    %255 = memref.load %arg1[%c40] : memref<98xf32, #tpu.memory_space<smem>>
    %c0_137 = arith.constant 0 : index
    %c5_138 = arith.constant 5 : index
    %c5_139 = arith.constant 5 : index
    %256 = vector.load %arg4[%c0_137, %c5_138, %c5_139] : memref<2x22x22xf32, #tpu.memory_space<vmem>>, vector<1x16x16xf32>
    %257 = vector.shape_cast %256 : vector<1x16x16xf32> to vector<16x16xf32>
    %258 = vector.broadcast %255 : f32 to vector<16x16xf32>
    %259 = arith.mulf %258, %257 : vector<16x16xf32>
    %260 = arith.addf %254, %259 : vector<16x16xf32>
    %c41 = arith.constant 41 : index
    %261 = memref.load %arg1[%c41] : memref<98xf32, #tpu.memory_space<smem>>
    %c0_140 = arith.constant 0 : index
    %c5_141 = arith.constant 5 : index
    %c6_142 = arith.constant 6 : index
    %262 = vector.load %arg4[%c0_140, %c5_141, %c6_142] : memref<2x22x22xf32, #tpu.memory_space<vmem>>, vector<1x16x16xf32>
    %263 = vector.shape_cast %262 : vector<1x16x16xf32> to vector<16x16xf32>
    %264 = vector.broadcast %261 : f32 to vector<16x16xf32>
    %265 = arith.mulf %264, %263 : vector<16x16xf32>
    %266 = arith.addf %260, %265 : vector<16x16xf32>
    %c42 = arith.constant 42 : index
    %267 = memref.load %arg1[%c42] : memref<98xf32, #tpu.memory_space<smem>>
    %c0_143 = arith.constant 0 : index
    %c6_144 = arith.constant 6 : index
    %c0_145 = arith.constant 0 : index
    %268 = vector.load %arg4[%c0_143, %c6_144, %c0_145] : memref<2x22x22xf32, #tpu.memory_space<vmem>>, vector<1x16x16xf32>
    %269 = vector.shape_cast %268 : vector<1x16x16xf32> to vector<16x16xf32>
    %270 = vector.broadcast %267 : f32 to vector<16x16xf32>
    %271 = arith.mulf %270, %269 : vector<16x16xf32>
    %272 = arith.addf %266, %271 : vector<16x16xf32>
    %c43 = arith.constant 43 : index
    %273 = memref.load %arg1[%c43] : memref<98xf32, #tpu.memory_space<smem>>
    %c0_146 = arith.constant 0 : index
    %c6_147 = arith.constant 6 : index
    %c1_148 = arith.constant 1 : index
    %274 = vector.load %arg4[%c0_146, %c6_147, %c1_148] : memref<2x22x22xf32, #tpu.memory_space<vmem>>, vector<1x16x16xf32>
    %275 = vector.shape_cast %274 : vector<1x16x16xf32> to vector<16x16xf32>
    %276 = vector.broadcast %273 : f32 to vector<16x16xf32>
    %277 = arith.mulf %276, %275 : vector<16x16xf32>
    %278 = arith.addf %272, %277 : vector<16x16xf32>
    %c44 = arith.constant 44 : index
    %279 = memref.load %arg1[%c44] : memref<98xf32, #tpu.memory_space<smem>>
    %c0_149 = arith.constant 0 : index
    %c6_150 = arith.constant 6 : index
    %c2_151 = arith.constant 2 : index
    %280 = vector.load %arg4[%c0_149, %c6_150, %c2_151] : memref<2x22x22xf32, #tpu.memory_space<vmem>>, vector<1x16x16xf32>
    %281 = vector.shape_cast %280 : vector<1x16x16xf32> to vector<16x16xf32>
    %282 = vector.broadcast %279 : f32 to vector<16x16xf32>
    %283 = arith.mulf %282, %281 : vector<16x16xf32>
    %284 = arith.addf %278, %283 : vector<16x16xf32>
    %c45 = arith.constant 45 : index
    %285 = memref.load %arg1[%c45] : memref<98xf32, #tpu.memory_space<smem>>
    %c0_152 = arith.constant 0 : index
    %c6_153 = arith.constant 6 : index
    %c3_154 = arith.constant 3 : index
    %286 = vector.load %arg4[%c0_152, %c6_153, %c3_154] : memref<2x22x22xf32, #tpu.memory_space<vmem>>, vector<1x16x16xf32>
    %287 = vector.shape_cast %286 : vector<1x16x16xf32> to vector<16x16xf32>
    %288 = vector.broadcast %285 : f32 to vector<16x16xf32>
    %289 = arith.mulf %288, %287 : vector<16x16xf32>
    %290 = arith.addf %284, %289 : vector<16x16xf32>
    %c46 = arith.constant 46 : index
    %291 = memref.load %arg1[%c46] : memref<98xf32, #tpu.memory_space<smem>>
    %c0_155 = arith.constant 0 : index
    %c6_156 = arith.constant 6 : index
    %c4_157 = arith.constant 4 : index
    %292 = vector.load %arg4[%c0_155, %c6_156, %c4_157] : memref<2x22x22xf32, #tpu.memory_space<vmem>>, vector<1x16x16xf32>
    %293 = vector.shape_cast %292 : vector<1x16x16xf32> to vector<16x16xf32>
    %294 = vector.broadcast %291 : f32 to vector<16x16xf32>
    %295 = arith.mulf %294, %293 : vector<16x16xf32>
    %296 = arith.addf %290, %295 : vector<16x16xf32>
    %c47 = arith.constant 47 : index
    %297 = memref.load %arg1[%c47] : memref<98xf32, #tpu.memory_space<smem>>
    %c0_158 = arith.constant 0 : index
    %c6_159 = arith.constant 6 : index
    %c5_160 = arith.constant 5 : index
    %298 = vector.load %arg4[%c0_158, %c6_159, %c5_160] : memref<2x22x22xf32, #tpu.memory_space<vmem>>, vector<1x16x16xf32>
    %299 = vector.shape_cast %298 : vector<1x16x16xf32> to vector<16x16xf32>
    %300 = vector.broadcast %297 : f32 to vector<16x16xf32>
    %301 = arith.mulf %300, %299 : vector<16x16xf32>
    %302 = arith.addf %296, %301 : vector<16x16xf32>
    %c48 = arith.constant 48 : index
    %303 = memref.load %arg1[%c48] : memref<98xf32, #tpu.memory_space<smem>>
    %c0_161 = arith.constant 0 : index
    %c6_162 = arith.constant 6 : index
    %c6_163 = arith.constant 6 : index
    %304 = vector.load %arg4[%c0_161, %c6_162, %c6_163] : memref<2x22x22xf32, #tpu.memory_space<vmem>>, vector<1x16x16xf32>
    %305 = vector.shape_cast %304 : vector<1x16x16xf32> to vector<16x16xf32>
    %306 = vector.broadcast %303 : f32 to vector<16x16xf32>
    %307 = arith.mulf %306, %305 : vector<16x16xf32>
    %308 = arith.addf %302, %307 : vector<16x16xf32>
    %c49 = arith.constant 49 : index
    %309 = memref.load %arg1[%c49] : memref<98xf32, #tpu.memory_space<smem>>
    %c1_164 = arith.constant 1 : index
    %c0_165 = arith.constant 0 : index
    %c0_166 = arith.constant 0 : index
    %310 = vector.load %arg4[%c1_164, %c0_165, %c0_166] : memref<2x22x22xf32, #tpu.memory_space<vmem>>, vector<1x16x16xf32>
    %311 = vector.shape_cast %310 : vector<1x16x16xf32> to vector<16x16xf32>
    %312 = vector.broadcast %309 : f32 to vector<16x16xf32>
    %313 = arith.mulf %312, %311 : vector<16x16xf32>
    %314 = arith.addf %308, %313 : vector<16x16xf32>
    %c50 = arith.constant 50 : index
    %315 = memref.load %arg1[%c50] : memref<98xf32, #tpu.memory_space<smem>>
    %c1_167 = arith.constant 1 : index
    %c0_168 = arith.constant 0 : index
    %c1_169 = arith.constant 1 : index
    %316 = vector.load %arg4[%c1_167, %c0_168, %c1_169] : memref<2x22x22xf32, #tpu.memory_space<vmem>>, vector<1x16x16xf32>
    %317 = vector.shape_cast %316 : vector<1x16x16xf32> to vector<16x16xf32>
    %318 = vector.broadcast %315 : f32 to vector<16x16xf32>
    %319 = arith.mulf %318, %317 : vector<16x16xf32>
    %320 = arith.addf %314, %319 : vector<16x16xf32>
    %c51 = arith.constant 51 : index
    %321 = memref.load %arg1[%c51] : memref<98xf32, #tpu.memory_space<smem>>
    %c1_170 = arith.constant 1 : index
    %c0_171 = arith.constant 0 : index
    %c2_172 = arith.constant 2 : index
    %322 = vector.load %arg4[%c1_170, %c0_171, %c2_172] : memref<2x22x22xf32, #tpu.memory_space<vmem>>, vector<1x16x16xf32>
    %323 = vector.shape_cast %322 : vector<1x16x16xf32> to vector<16x16xf32>
    %324 = vector.broadcast %321 : f32 to vector<16x16xf32>
    %325 = arith.mulf %324, %323 : vector<16x16xf32>
    %326 = arith.addf %320, %325 : vector<16x16xf32>
    %c52 = arith.constant 52 : index
    %327 = memref.load %arg1[%c52] : memref<98xf32, #tpu.memory_space<smem>>
    %c1_173 = arith.constant 1 : index
    %c0_174 = arith.constant 0 : index
    %c3_175 = arith.constant 3 : index
    %328 = vector.load %arg4[%c1_173, %c0_174, %c3_175] : memref<2x22x22xf32, #tpu.memory_space<vmem>>, vector<1x16x16xf32>
    %329 = vector.shape_cast %328 : vector<1x16x16xf32> to vector<16x16xf32>
    %330 = vector.broadcast %327 : f32 to vector<16x16xf32>
    %331 = arith.mulf %330, %329 : vector<16x16xf32>
    %332 = arith.addf %326, %331 : vector<16x16xf32>
    %c53 = arith.constant 53 : index
    %333 = memref.load %arg1[%c53] : memref<98xf32, #tpu.memory_space<smem>>
    %c1_176 = arith.constant 1 : index
    %c0_177 = arith.constant 0 : index
    %c4_178 = arith.constant 4 : index
    %334 = vector.load %arg4[%c1_176, %c0_177, %c4_178] : memref<2x22x22xf32, #tpu.memory_space<vmem>>, vector<1x16x16xf32>
    %335 = vector.shape_cast %334 : vector<1x16x16xf32> to vector<16x16xf32>
    %336 = vector.broadcast %333 : f32 to vector<16x16xf32>
    %337 = arith.mulf %336, %335 : vector<16x16xf32>
    %338 = arith.addf %332, %337 : vector<16x16xf32>
    %c54 = arith.constant 54 : index
    %339 = memref.load %arg1[%c54] : memref<98xf32, #tpu.memory_space<smem>>
    %c1_179 = arith.constant 1 : index
    %c0_180 = arith.constant 0 : index
    %c5_181 = arith.constant 5 : index
    %340 = vector.load %arg4[%c1_179, %c0_180, %c5_181] : memref<2x22x22xf32, #tpu.memory_space<vmem>>, vector<1x16x16xf32>
    %341 = vector.shape_cast %340 : vector<1x16x16xf32> to vector<16x16xf32>
    %342 = vector.broadcast %339 : f32 to vector<16x16xf32>
    %343 = arith.mulf %342, %341 : vector<16x16xf32>
    %344 = arith.addf %338, %343 : vector<16x16xf32>
    %c55 = arith.constant 55 : index
    %345 = memref.load %arg1[%c55] : memref<98xf32, #tpu.memory_space<smem>>
    %c1_182 = arith.constant 1 : index
    %c0_183 = arith.constant 0 : index
    %c6_184 = arith.constant 6 : index
    %346 = vector.load %arg4[%c1_182, %c0_183, %c6_184] : memref<2x22x22xf32, #tpu.memory_space<vmem>>, vector<1x16x16xf32>
    %347 = vector.shape_cast %346 : vector<1x16x16xf32> to vector<16x16xf32>
    %348 = vector.broadcast %345 : f32 to vector<16x16xf32>
    %349 = arith.mulf %348, %347 : vector<16x16xf32>
    %350 = arith.addf %344, %349 : vector<16x16xf32>
    %c56 = arith.constant 56 : index
    %351 = memref.load %arg1[%c56] : memref<98xf32, #tpu.memory_space<smem>>
    %c1_185 = arith.constant 1 : index
    %c1_186 = arith.constant 1 : index
    %c0_187 = arith.constant 0 : index
    %352 = vector.load %arg4[%c1_185, %c1_186, %c0_187] : memref<2x22x22xf32, #tpu.memory_space<vmem>>, vector<1x16x16xf32>
    %353 = vector.shape_cast %352 : vector<1x16x16xf32> to vector<16x16xf32>
    %354 = vector.broadcast %351 : f32 to vector<16x16xf32>
    %355 = arith.mulf %354, %353 : vector<16x16xf32>
    %356 = arith.addf %350, %355 : vector<16x16xf32>
    %c57 = arith.constant 57 : index
    %357 = memref.load %arg1[%c57] : memref<98xf32, #tpu.memory_space<smem>>
    %c1_188 = arith.constant 1 : index
    %c1_189 = arith.constant 1 : index
    %c1_190 = arith.constant 1 : index
    %358 = vector.load %arg4[%c1_188, %c1_189, %c1_190] : memref<2x22x22xf32, #tpu.memory_space<vmem>>, vector<1x16x16xf32>
    %359 = vector.shape_cast %358 : vector<1x16x16xf32> to vector<16x16xf32>
    %360 = vector.broadcast %357 : f32 to vector<16x16xf32>
    %361 = arith.mulf %360, %359 : vector<16x16xf32>
    %362 = arith.addf %356, %361 : vector<16x16xf32>
    %c58 = arith.constant 58 : index
    %363 = memref.load %arg1[%c58] : memref<98xf32, #tpu.memory_space<smem>>
    %c1_191 = arith.constant 1 : index
    %c1_192 = arith.constant 1 : index
    %c2_193 = arith.constant 2 : index
    %364 = vector.load %arg4[%c1_191, %c1_192, %c2_193] : memref<2x22x22xf32, #tpu.memory_space<vmem>>, vector<1x16x16xf32>
    %365 = vector.shape_cast %364 : vector<1x16x16xf32> to vector<16x16xf32>
    %366 = vector.broadcast %363 : f32 to vector<16x16xf32>
    %367 = arith.mulf %366, %365 : vector<16x16xf32>
    %368 = arith.addf %362, %367 : vector<16x16xf32>
    %c59 = arith.constant 59 : index
    %369 = memref.load %arg1[%c59] : memref<98xf32, #tpu.memory_space<smem>>
    %c1_194 = arith.constant 1 : index
    %c1_195 = arith.constant 1 : index
    %c3_196 = arith.constant 3 : index
    %370 = vector.load %arg4[%c1_194, %c1_195, %c3_196] : memref<2x22x22xf32, #tpu.memory_space<vmem>>, vector<1x16x16xf32>
    %371 = vector.shape_cast %370 : vector<1x16x16xf32> to vector<16x16xf32>
    %372 = vector.broadcast %369 : f32 to vector<16x16xf32>
    %373 = arith.mulf %372, %371 : vector<16x16xf32>
    %374 = arith.addf %368, %373 : vector<16x16xf32>
    %c60 = arith.constant 60 : index
    %375 = memref.load %arg1[%c60] : memref<98xf32, #tpu.memory_space<smem>>
    %c1_197 = arith.constant 1 : index
    %c1_198 = arith.constant 1 : index
    %c4_199 = arith.constant 4 : index
    %376 = vector.load %arg4[%c1_197, %c1_198, %c4_199] : memref<2x22x22xf32, #tpu.memory_space<vmem>>, vector<1x16x16xf32>
    %377 = vector.shape_cast %376 : vector<1x16x16xf32> to vector<16x16xf32>
    %378 = vector.broadcast %375 : f32 to vector<16x16xf32>
    %379 = arith.mulf %378, %377 : vector<16x16xf32>
    %380 = arith.addf %374, %379 : vector<16x16xf32>
    %c61 = arith.constant 61 : index
    %381 = memref.load %arg1[%c61] : memref<98xf32, #tpu.memory_space<smem>>
    %c1_200 = arith.constant 1 : index
    %c1_201 = arith.constant 1 : index
    %c5_202 = arith.constant 5 : index
    %382 = vector.load %arg4[%c1_200, %c1_201, %c5_202] : memref<2x22x22xf32, #tpu.memory_space<vmem>>, vector<1x16x16xf32>
    %383 = vector.shape_cast %382 : vector<1x16x16xf32> to vector<16x16xf32>
    %384 = vector.broadcast %381 : f32 to vector<16x16xf32>
    %385 = arith.mulf %384, %383 : vector<16x16xf32>
    %386 = arith.addf %380, %385 : vector<16x16xf32>
    %c62 = arith.constant 62 : index
    %387 = memref.load %arg1[%c62] : memref<98xf32, #tpu.memory_space<smem>>
    %c1_203 = arith.constant 1 : index
    %c1_204 = arith.constant 1 : index
    %c6_205 = arith.constant 6 : index
    %388 = vector.load %arg4[%c1_203, %c1_204, %c6_205] : memref<2x22x22xf32, #tpu.memory_space<vmem>>, vector<1x16x16xf32>
    %389 = vector.shape_cast %388 : vector<1x16x16xf32> to vector<16x16xf32>
    %390 = vector.broadcast %387 : f32 to vector<16x16xf32>
    %391 = arith.mulf %390, %389 : vector<16x16xf32>
    %392 = arith.addf %386, %391 : vector<16x16xf32>
    %c63 = arith.constant 63 : index
    %393 = memref.load %arg1[%c63] : memref<98xf32, #tpu.memory_space<smem>>
    %c1_206 = arith.constant 1 : index
    %c2_207 = arith.constant 2 : index
    %c0_208 = arith.constant 0 : index
    %394 = vector.load %arg4[%c1_206, %c2_207, %c0_208] : memref<2x22x22xf32, #tpu.memory_space<vmem>>, vector<1x16x16xf32>
    %395 = vector.shape_cast %394 : vector<1x16x16xf32> to vector<16x16xf32>
    %396 = vector.broadcast %393 : f32 to vector<16x16xf32>
    %397 = arith.mulf %396, %395 : vector<16x16xf32>
    %398 = arith.addf %392, %397 : vector<16x16xf32>
    %c64 = arith.constant 64 : index
    %399 = memref.load %arg1[%c64] : memref<98xf32, #tpu.memory_space<smem>>
    %c1_209 = arith.constant 1 : index
    %c2_210 = arith.constant 2 : index
    %c1_211 = arith.constant 1 : index
    %400 = vector.load %arg4[%c1_209, %c2_210, %c1_211] : memref<2x22x22xf32, #tpu.memory_space<vmem>>, vector<1x16x16xf32>
    %401 = vector.shape_cast %400 : vector<1x16x16xf32> to vector<16x16xf32>
    %402 = vector.broadcast %399 : f32 to vector<16x16xf32>
    %403 = arith.mulf %402, %401 : vector<16x16xf32>
    %404 = arith.addf %398, %403 : vector<16x16xf32>
    %c65 = arith.constant 65 : index
    %405 = memref.load %arg1[%c65] : memref<98xf32, #tpu.memory_space<smem>>
    %c1_212 = arith.constant 1 : index
    %c2_213 = arith.constant 2 : index
    %c2_214 = arith.constant 2 : index
    %406 = vector.load %arg4[%c1_212, %c2_213, %c2_214] : memref<2x22x22xf32, #tpu.memory_space<vmem>>, vector<1x16x16xf32>
    %407 = vector.shape_cast %406 : vector<1x16x16xf32> to vector<16x16xf32>
    %408 = vector.broadcast %405 : f32 to vector<16x16xf32>
    %409 = arith.mulf %408, %407 : vector<16x16xf32>
    %410 = arith.addf %404, %409 : vector<16x16xf32>
    %c66 = arith.constant 66 : index
    %411 = memref.load %arg1[%c66] : memref<98xf32, #tpu.memory_space<smem>>
    %c1_215 = arith.constant 1 : index
    %c2_216 = arith.constant 2 : index
    %c3_217 = arith.constant 3 : index
    %412 = vector.load %arg4[%c1_215, %c2_216, %c3_217] : memref<2x22x22xf32, #tpu.memory_space<vmem>>, vector<1x16x16xf32>
    %413 = vector.shape_cast %412 : vector<1x16x16xf32> to vector<16x16xf32>
    %414 = vector.broadcast %411 : f32 to vector<16x16xf32>
    %415 = arith.mulf %414, %413 : vector<16x16xf32>
    %416 = arith.addf %410, %415 : vector<16x16xf32>
    %c67 = arith.constant 67 : index
    %417 = memref.load %arg1[%c67] : memref<98xf32, #tpu.memory_space<smem>>
    %c1_218 = arith.constant 1 : index
    %c2_219 = arith.constant 2 : index
    %c4_220 = arith.constant 4 : index
    %418 = vector.load %arg4[%c1_218, %c2_219, %c4_220] : memref<2x22x22xf32, #tpu.memory_space<vmem>>, vector<1x16x16xf32>
    %419 = vector.shape_cast %418 : vector<1x16x16xf32> to vector<16x16xf32>
    %420 = vector.broadcast %417 : f32 to vector<16x16xf32>
    %421 = arith.mulf %420, %419 : vector<16x16xf32>
    %422 = arith.addf %416, %421 : vector<16x16xf32>
    %c68 = arith.constant 68 : index
    %423 = memref.load %arg1[%c68] : memref<98xf32, #tpu.memory_space<smem>>
    %c1_221 = arith.constant 1 : index
    %c2_222 = arith.constant 2 : index
    %c5_223 = arith.constant 5 : index
    %424 = vector.load %arg4[%c1_221, %c2_222, %c5_223] : memref<2x22x22xf32, #tpu.memory_space<vmem>>, vector<1x16x16xf32>
    %425 = vector.shape_cast %424 : vector<1x16x16xf32> to vector<16x16xf32>
    %426 = vector.broadcast %423 : f32 to vector<16x16xf32>
    %427 = arith.mulf %426, %425 : vector<16x16xf32>
    %428 = arith.addf %422, %427 : vector<16x16xf32>
    %c69 = arith.constant 69 : index
    %429 = memref.load %arg1[%c69] : memref<98xf32, #tpu.memory_space<smem>>
    %c1_224 = arith.constant 1 : index
    %c2_225 = arith.constant 2 : index
    %c6_226 = arith.constant 6 : index
    %430 = vector.load %arg4[%c1_224, %c2_225, %c6_226] : memref<2x22x22xf32, #tpu.memory_space<vmem>>, vector<1x16x16xf32>
    %431 = vector.shape_cast %430 : vector<1x16x16xf32> to vector<16x16xf32>
    %432 = vector.broadcast %429 : f32 to vector<16x16xf32>
    %433 = arith.mulf %432, %431 : vector<16x16xf32>
    %434 = arith.addf %428, %433 : vector<16x16xf32>
    %c70 = arith.constant 70 : index
    %435 = memref.load %arg1[%c70] : memref<98xf32, #tpu.memory_space<smem>>
    %c1_227 = arith.constant 1 : index
    %c3_228 = arith.constant 3 : index
    %c0_229 = arith.constant 0 : index
    %436 = vector.load %arg4[%c1_227, %c3_228, %c0_229] : memref<2x22x22xf32, #tpu.memory_space<vmem>>, vector<1x16x16xf32>
    %437 = vector.shape_cast %436 : vector<1x16x16xf32> to vector<16x16xf32>
    %438 = vector.broadcast %435 : f32 to vector<16x16xf32>
    %439 = arith.mulf %438, %437 : vector<16x16xf32>
    %440 = arith.addf %434, %439 : vector<16x16xf32>
    %c71 = arith.constant 71 : index
    %441 = memref.load %arg1[%c71] : memref<98xf32, #tpu.memory_space<smem>>
    %c1_230 = arith.constant 1 : index
    %c3_231 = arith.constant 3 : index
    %c1_232 = arith.constant 1 : index
    %442 = vector.load %arg4[%c1_230, %c3_231, %c1_232] : memref<2x22x22xf32, #tpu.memory_space<vmem>>, vector<1x16x16xf32>
    %443 = vector.shape_cast %442 : vector<1x16x16xf32> to vector<16x16xf32>
    %444 = vector.broadcast %441 : f32 to vector<16x16xf32>
    %445 = arith.mulf %444, %443 : vector<16x16xf32>
    %446 = arith.addf %440, %445 : vector<16x16xf32>
    %c72 = arith.constant 72 : index
    %447 = memref.load %arg1[%c72] : memref<98xf32, #tpu.memory_space<smem>>
    %c1_233 = arith.constant 1 : index
    %c3_234 = arith.constant 3 : index
    %c2_235 = arith.constant 2 : index
    %448 = vector.load %arg4[%c1_233, %c3_234, %c2_235] : memref<2x22x22xf32, #tpu.memory_space<vmem>>, vector<1x16x16xf32>
    %449 = vector.shape_cast %448 : vector<1x16x16xf32> to vector<16x16xf32>
    %450 = vector.broadcast %447 : f32 to vector<16x16xf32>
    %451 = arith.mulf %450, %449 : vector<16x16xf32>
    %452 = arith.addf %446, %451 : vector<16x16xf32>
    %c73 = arith.constant 73 : index
    %453 = memref.load %arg1[%c73] : memref<98xf32, #tpu.memory_space<smem>>
    %c1_236 = arith.constant 1 : index
    %c3_237 = arith.constant 3 : index
    %c3_238 = arith.constant 3 : index
    %454 = vector.load %arg4[%c1_236, %c3_237, %c3_238] : memref<2x22x22xf32, #tpu.memory_space<vmem>>, vector<1x16x16xf32>
    %455 = vector.shape_cast %454 : vector<1x16x16xf32> to vector<16x16xf32>
    %456 = vector.broadcast %453 : f32 to vector<16x16xf32>
    %457 = arith.mulf %456, %455 : vector<16x16xf32>
    %458 = arith.addf %452, %457 : vector<16x16xf32>
    %c74 = arith.constant 74 : index
    %459 = memref.load %arg1[%c74] : memref<98xf32, #tpu.memory_space<smem>>
    %c1_239 = arith.constant 1 : index
    %c3_240 = arith.constant 3 : index
    %c4_241 = arith.constant 4 : index
    %460 = vector.load %arg4[%c1_239, %c3_240, %c4_241] : memref<2x22x22xf32, #tpu.memory_space<vmem>>, vector<1x16x16xf32>
    %461 = vector.shape_cast %460 : vector<1x16x16xf32> to vector<16x16xf32>
    %462 = vector.broadcast %459 : f32 to vector<16x16xf32>
    %463 = arith.mulf %462, %461 : vector<16x16xf32>
    %464 = arith.addf %458, %463 : vector<16x16xf32>
    %c75 = arith.constant 75 : index
    %465 = memref.load %arg1[%c75] : memref<98xf32, #tpu.memory_space<smem>>
    %c1_242 = arith.constant 1 : index
    %c3_243 = arith.constant 3 : index
    %c5_244 = arith.constant 5 : index
    %466 = vector.load %arg4[%c1_242, %c3_243, %c5_244] : memref<2x22x22xf32, #tpu.memory_space<vmem>>, vector<1x16x16xf32>
    %467 = vector.shape_cast %466 : vector<1x16x16xf32> to vector<16x16xf32>
    %468 = vector.broadcast %465 : f32 to vector<16x16xf32>
    %469 = arith.mulf %468, %467 : vector<16x16xf32>
    %470 = arith.addf %464, %469 : vector<16x16xf32>
    %c76 = arith.constant 76 : index
    %471 = memref.load %arg1[%c76] : memref<98xf32, #tpu.memory_space<smem>>
    %c1_245 = arith.constant 1 : index
    %c3_246 = arith.constant 3 : index
    %c6_247 = arith.constant 6 : index
    %472 = vector.load %arg4[%c1_245, %c3_246, %c6_247] : memref<2x22x22xf32, #tpu.memory_space<vmem>>, vector<1x16x16xf32>
    %473 = vector.shape_cast %472 : vector<1x16x16xf32> to vector<16x16xf32>
    %474 = vector.broadcast %471 : f32 to vector<16x16xf32>
    %475 = arith.mulf %474, %473 : vector<16x16xf32>
    %476 = arith.addf %470, %475 : vector<16x16xf32>
    %c77 = arith.constant 77 : index
    %477 = memref.load %arg1[%c77] : memref<98xf32, #tpu.memory_space<smem>>
    %c1_248 = arith.constant 1 : index
    %c4_249 = arith.constant 4 : index
    %c0_250 = arith.constant 0 : index
    %478 = vector.load %arg4[%c1_248, %c4_249, %c0_250] : memref<2x22x22xf32, #tpu.memory_space<vmem>>, vector<1x16x16xf32>
    %479 = vector.shape_cast %478 : vector<1x16x16xf32> to vector<16x16xf32>
    %480 = vector.broadcast %477 : f32 to vector<16x16xf32>
    %481 = arith.mulf %480, %479 : vector<16x16xf32>
    %482 = arith.addf %476, %481 : vector<16x16xf32>
    %c78 = arith.constant 78 : index
    %483 = memref.load %arg1[%c78] : memref<98xf32, #tpu.memory_space<smem>>
    %c1_251 = arith.constant 1 : index
    %c4_252 = arith.constant 4 : index
    %c1_253 = arith.constant 1 : index
    %484 = vector.load %arg4[%c1_251, %c4_252, %c1_253] : memref<2x22x22xf32, #tpu.memory_space<vmem>>, vector<1x16x16xf32>
    %485 = vector.shape_cast %484 : vector<1x16x16xf32> to vector<16x16xf32>
    %486 = vector.broadcast %483 : f32 to vector<16x16xf32>
    %487 = arith.mulf %486, %485 : vector<16x16xf32>
    %488 = arith.addf %482, %487 : vector<16x16xf32>
    %c79 = arith.constant 79 : index
    %489 = memref.load %arg1[%c79] : memref<98xf32, #tpu.memory_space<smem>>
    %c1_254 = arith.constant 1 : index
    %c4_255 = arith.constant 4 : index
    %c2_256 = arith.constant 2 : index
    %490 = vector.load %arg4[%c1_254, %c4_255, %c2_256] : memref<2x22x22xf32, #tpu.memory_space<vmem>>, vector<1x16x16xf32>
    %491 = vector.shape_cast %490 : vector<1x16x16xf32> to vector<16x16xf32>
    %492 = vector.broadcast %489 : f32 to vector<16x16xf32>
    %493 = arith.mulf %492, %491 : vector<16x16xf32>
    %494 = arith.addf %488, %493 : vector<16x16xf32>
    %c80 = arith.constant 80 : index
    %495 = memref.load %arg1[%c80] : memref<98xf32, #tpu.memory_space<smem>>
    %c1_257 = arith.constant 1 : index
    %c4_258 = arith.constant 4 : index
    %c3_259 = arith.constant 3 : index
    %496 = vector.load %arg4[%c1_257, %c4_258, %c3_259] : memref<2x22x22xf32, #tpu.memory_space<vmem>>, vector<1x16x16xf32>
    %497 = vector.shape_cast %496 : vector<1x16x16xf32> to vector<16x16xf32>
    %498 = vector.broadcast %495 : f32 to vector<16x16xf32>
    %499 = arith.mulf %498, %497 : vector<16x16xf32>
    %500 = arith.addf %494, %499 : vector<16x16xf32>
    %c81 = arith.constant 81 : index
    %501 = memref.load %arg1[%c81] : memref<98xf32, #tpu.memory_space<smem>>
    %c1_260 = arith.constant 1 : index
    %c4_261 = arith.constant 4 : index
    %c4_262 = arith.constant 4 : index
    %502 = vector.load %arg4[%c1_260, %c4_261, %c4_262] : memref<2x22x22xf32, #tpu.memory_space<vmem>>, vector<1x16x16xf32>
    %503 = vector.shape_cast %502 : vector<1x16x16xf32> to vector<16x16xf32>
    %504 = vector.broadcast %501 : f32 to vector<16x16xf32>
    %505 = arith.mulf %504, %503 : vector<16x16xf32>
    %506 = arith.addf %500, %505 : vector<16x16xf32>
    %c82 = arith.constant 82 : index
    %507 = memref.load %arg1[%c82] : memref<98xf32, #tpu.memory_space<smem>>
    %c1_263 = arith.constant 1 : index
    %c4_264 = arith.constant 4 : index
    %c5_265 = arith.constant 5 : index
    %508 = vector.load %arg4[%c1_263, %c4_264, %c5_265] : memref<2x22x22xf32, #tpu.memory_space<vmem>>, vector<1x16x16xf32>
    %509 = vector.shape_cast %508 : vector<1x16x16xf32> to vector<16x16xf32>
    %510 = vector.broadcast %507 : f32 to vector<16x16xf32>
    %511 = arith.mulf %510, %509 : vector<16x16xf32>
    %512 = arith.addf %506, %511 : vector<16x16xf32>
    %c83 = arith.constant 83 : index
    %513 = memref.load %arg1[%c83] : memref<98xf32, #tpu.memory_space<smem>>
    %c1_266 = arith.constant 1 : index
    %c4_267 = arith.constant 4 : index
    %c6_268 = arith.constant 6 : index
    %514 = vector.load %arg4[%c1_266, %c4_267, %c6_268] : memref<2x22x22xf32, #tpu.memory_space<vmem>>, vector<1x16x16xf32>
    %515 = vector.shape_cast %514 : vector<1x16x16xf32> to vector<16x16xf32>
    %516 = vector.broadcast %513 : f32 to vector<16x16xf32>
    %517 = arith.mulf %516, %515 : vector<16x16xf32>
    %518 = arith.addf %512, %517 : vector<16x16xf32>
    %c84 = arith.constant 84 : index
    %519 = memref.load %arg1[%c84] : memref<98xf32, #tpu.memory_space<smem>>
    %c1_269 = arith.constant 1 : index
    %c5_270 = arith.constant 5 : index
    %c0_271 = arith.constant 0 : index
    %520 = vector.load %arg4[%c1_269, %c5_270, %c0_271] : memref<2x22x22xf32, #tpu.memory_space<vmem>>, vector<1x16x16xf32>
    %521 = vector.shape_cast %520 : vector<1x16x16xf32> to vector<16x16xf32>
    %522 = vector.broadcast %519 : f32 to vector<16x16xf32>
    %523 = arith.mulf %522, %521 : vector<16x16xf32>
    %524 = arith.addf %518, %523 : vector<16x16xf32>
    %c85 = arith.constant 85 : index
    %525 = memref.load %arg1[%c85] : memref<98xf32, #tpu.memory_space<smem>>
    %c1_272 = arith.constant 1 : index
    %c5_273 = arith.constant 5 : index
    %c1_274 = arith.constant 1 : index
    %526 = vector.load %arg4[%c1_272, %c5_273, %c1_274] : memref<2x22x22xf32, #tpu.memory_space<vmem>>, vector<1x16x16xf32>
    %527 = vector.shape_cast %526 : vector<1x16x16xf32> to vector<16x16xf32>
    %528 = vector.broadcast %525 : f32 to vector<16x16xf32>
    %529 = arith.mulf %528, %527 : vector<16x16xf32>
    %530 = arith.addf %524, %529 : vector<16x16xf32>
    %c86 = arith.constant 86 : index
    %531 = memref.load %arg1[%c86] : memref<98xf32, #tpu.memory_space<smem>>
    %c1_275 = arith.constant 1 : index
    %c5_276 = arith.constant 5 : index
    %c2_277 = arith.constant 2 : index
    %532 = vector.load %arg4[%c1_275, %c5_276, %c2_277] : memref<2x22x22xf32, #tpu.memory_space<vmem>>, vector<1x16x16xf32>
    %533 = vector.shape_cast %532 : vector<1x16x16xf32> to vector<16x16xf32>
    %534 = vector.broadcast %531 : f32 to vector<16x16xf32>
    %535 = arith.mulf %534, %533 : vector<16x16xf32>
    %536 = arith.addf %530, %535 : vector<16x16xf32>
    %c87 = arith.constant 87 : index
    %537 = memref.load %arg1[%c87] : memref<98xf32, #tpu.memory_space<smem>>
    %c1_278 = arith.constant 1 : index
    %c5_279 = arith.constant 5 : index
    %c3_280 = arith.constant 3 : index
    %538 = vector.load %arg4[%c1_278, %c5_279, %c3_280] : memref<2x22x22xf32, #tpu.memory_space<vmem>>, vector<1x16x16xf32>
    %539 = vector.shape_cast %538 : vector<1x16x16xf32> to vector<16x16xf32>
    %540 = vector.broadcast %537 : f32 to vector<16x16xf32>
    %541 = arith.mulf %540, %539 : vector<16x16xf32>
    %542 = arith.addf %536, %541 : vector<16x16xf32>
    %c88 = arith.constant 88 : index
    %543 = memref.load %arg1[%c88] : memref<98xf32, #tpu.memory_space<smem>>
    %c1_281 = arith.constant 1 : index
    %c5_282 = arith.constant 5 : index
    %c4_283 = arith.constant 4 : index
    %544 = vector.load %arg4[%c1_281, %c5_282, %c4_283] : memref<2x22x22xf32, #tpu.memory_space<vmem>>, vector<1x16x16xf32>
    %545 = vector.shape_cast %544 : vector<1x16x16xf32> to vector<16x16xf32>
    %546 = vector.broadcast %543 : f32 to vector<16x16xf32>
    %547 = arith.mulf %546, %545 : vector<16x16xf32>
    %548 = arith.addf %542, %547 : vector<16x16xf32>
    %c89 = arith.constant 89 : index
    %549 = memref.load %arg1[%c89] : memref<98xf32, #tpu.memory_space<smem>>
    %c1_284 = arith.constant 1 : index
    %c5_285 = arith.constant 5 : index
    %c5_286 = arith.constant 5 : index
    %550 = vector.load %arg4[%c1_284, %c5_285, %c5_286] : memref<2x22x22xf32, #tpu.memory_space<vmem>>, vector<1x16x16xf32>
    %551 = vector.shape_cast %550 : vector<1x16x16xf32> to vector<16x16xf32>
    %552 = vector.broadcast %549 : f32 to vector<16x16xf32>
    %553 = arith.mulf %552, %551 : vector<16x16xf32>
    %554 = arith.addf %548, %553 : vector<16x16xf32>
    %c90 = arith.constant 90 : index
    %555 = memref.load %arg1[%c90] : memref<98xf32, #tpu.memory_space<smem>>
    %c1_287 = arith.constant 1 : index
    %c5_288 = arith.constant 5 : index
    %c6_289 = arith.constant 6 : index
    %556 = vector.load %arg4[%c1_287, %c5_288, %c6_289] : memref<2x22x22xf32, #tpu.memory_space<vmem>>, vector<1x16x16xf32>
    %557 = vector.shape_cast %556 : vector<1x16x16xf32> to vector<16x16xf32>
    %558 = vector.broadcast %555 : f32 to vector<16x16xf32>
    %559 = arith.mulf %558, %557 : vector<16x16xf32>
    %560 = arith.addf %554, %559 : vector<16x16xf32>
    %c91 = arith.constant 91 : index
    %561 = memref.load %arg1[%c91] : memref<98xf32, #tpu.memory_space<smem>>
    %c1_290 = arith.constant 1 : index
    %c6_291 = arith.constant 6 : index
    %c0_292 = arith.constant 0 : index
    %562 = vector.load %arg4[%c1_290, %c6_291, %c0_292] : memref<2x22x22xf32, #tpu.memory_space<vmem>>, vector<1x16x16xf32>
    %563 = vector.shape_cast %562 : vector<1x16x16xf32> to vector<16x16xf32>
    %564 = vector.broadcast %561 : f32 to vector<16x16xf32>
    %565 = arith.mulf %564, %563 : vector<16x16xf32>
    %566 = arith.addf %560, %565 : vector<16x16xf32>
    %c92 = arith.constant 92 : index
    %567 = memref.load %arg1[%c92] : memref<98xf32, #tpu.memory_space<smem>>
    %c1_293 = arith.constant 1 : index
    %c6_294 = arith.constant 6 : index
    %c1_295 = arith.constant 1 : index
    %568 = vector.load %arg4[%c1_293, %c6_294, %c1_295] : memref<2x22x22xf32, #tpu.memory_space<vmem>>, vector<1x16x16xf32>
    %569 = vector.shape_cast %568 : vector<1x16x16xf32> to vector<16x16xf32>
    %570 = vector.broadcast %567 : f32 to vector<16x16xf32>
    %571 = arith.mulf %570, %569 : vector<16x16xf32>
    %572 = arith.addf %566, %571 : vector<16x16xf32>
    %c93 = arith.constant 93 : index
    %573 = memref.load %arg1[%c93] : memref<98xf32, #tpu.memory_space<smem>>
    %c1_296 = arith.constant 1 : index
    %c6_297 = arith.constant 6 : index
    %c2_298 = arith.constant 2 : index
    %574 = vector.load %arg4[%c1_296, %c6_297, %c2_298] : memref<2x22x22xf32, #tpu.memory_space<vmem>>, vector<1x16x16xf32>
    %575 = vector.shape_cast %574 : vector<1x16x16xf32> to vector<16x16xf32>
    %576 = vector.broadcast %573 : f32 to vector<16x16xf32>
    %577 = arith.mulf %576, %575 : vector<16x16xf32>
    %578 = arith.addf %572, %577 : vector<16x16xf32>
    %c94 = arith.constant 94 : index
    %579 = memref.load %arg1[%c94] : memref<98xf32, #tpu.memory_space<smem>>
    %c1_299 = arith.constant 1 : index
    %c6_300 = arith.constant 6 : index
    %c3_301 = arith.constant 3 : index
    %580 = vector.load %arg4[%c1_299, %c6_300, %c3_301] : memref<2x22x22xf32, #tpu.memory_space<vmem>>, vector<1x16x16xf32>
    %581 = vector.shape_cast %580 : vector<1x16x16xf32> to vector<16x16xf32>
    %582 = vector.broadcast %579 : f32 to vector<16x16xf32>
    %583 = arith.mulf %582, %581 : vector<16x16xf32>
    %584 = arith.addf %578, %583 : vector<16x16xf32>
    %c95 = arith.constant 95 : index
    %585 = memref.load %arg1[%c95] : memref<98xf32, #tpu.memory_space<smem>>
    %c1_302 = arith.constant 1 : index
    %c6_303 = arith.constant 6 : index
    %c4_304 = arith.constant 4 : index
    %586 = vector.load %arg4[%c1_302, %c6_303, %c4_304] : memref<2x22x22xf32, #tpu.memory_space<vmem>>, vector<1x16x16xf32>
    %587 = vector.shape_cast %586 : vector<1x16x16xf32> to vector<16x16xf32>
    %588 = vector.broadcast %585 : f32 to vector<16x16xf32>
    %589 = arith.mulf %588, %587 : vector<16x16xf32>
    %590 = arith.addf %584, %589 : vector<16x16xf32>
    %c96 = arith.constant 96 : index
    %591 = memref.load %arg1[%c96] : memref<98xf32, #tpu.memory_space<smem>>
    %c1_305 = arith.constant 1 : index
    %c6_306 = arith.constant 6 : index
    %c5_307 = arith.constant 5 : index
    %592 = vector.load %arg4[%c1_305, %c6_306, %c5_307] : memref<2x22x22xf32, #tpu.memory_space<vmem>>, vector<1x16x16xf32>
    %593 = vector.shape_cast %592 : vector<1x16x16xf32> to vector<16x16xf32>
    %594 = vector.broadcast %591 : f32 to vector<16x16xf32>
    %595 = arith.mulf %594, %593 : vector<16x16xf32>
    %596 = arith.addf %590, %595 : vector<16x16xf32>
    %c97 = arith.constant 97 : index
    %597 = memref.load %arg1[%c97] : memref<98xf32, #tpu.memory_space<smem>>
    %c1_308 = arith.constant 1 : index
    %c6_309 = arith.constant 6 : index
    %c6_310 = arith.constant 6 : index
    %598 = vector.load %arg4[%c1_308, %c6_309, %c6_310] : memref<2x22x22xf32, #tpu.memory_space<vmem>>, vector<1x16x16xf32>
    %599 = vector.shape_cast %598 : vector<1x16x16xf32> to vector<16x16xf32>
    %600 = vector.broadcast %597 : f32 to vector<16x16xf32>
    %601 = arith.mulf %600, %599 : vector<16x16xf32>
    %602 = arith.addf %596, %601 : vector<16x16xf32>
    %603 = arith.negf %602 : vector<16x16xf32>
    %604 = math.exp %603 : vector<16x16xf32>
    %cst_311 = arith.constant 1.000000e+00 : f32
    %605 = vector.broadcast %cst_311 : f32 to vector<16x16xf32>
    %606 = arith.addf %605, %604 : vector<16x16xf32>
    %607 = arith.divf %605, %606 : vector<16x16xf32>
    %c0_312 = arith.constant 0 : index
    %c0_313 = arith.constant 0 : index
    %c0_314 = arith.constant 0 : index
    %c0_315 = arith.constant 0 : index
    %608 = vector.load %arg3[%c0_312, %c0_313, %c0_314, %c0_315] : memref<1x1x16x16xf32, #tpu.memory_space<vmem>>, vector<1x1x16x16xf32>
    %609 = vector.shape_cast %608 : vector<1x1x16x16xf32> to vector<16x16xf32>
    %610 = vector.shape_cast %607 : vector<16x16xf32> to vector<1x1x16x16xf32>
    tpu.vector_store %arg3[%c0_312, %c0_313, %c0_314, %c0_315], %610 {strides = array<i32>} : memref<1x1x16x16xf32, #tpu.memory_space<vmem>>, vector<1x1x16x16xf32>,
    return
  }
  func.func @transform_0(%arg0: i32) -> i32 {
    %c0_i32 = arith.constant 0 : i32
    %c0_i32_0 = arith.constant 0 : i32
    return %c0_i32 : i32
  }
  func.func @transform_1(%arg0: i32) -> (i32, i32, i32, i32) {
    %c0_i32 = arith.constant 0 : i32
    %c0_i32_0 = arith.constant 0 : i32
    %c0_i32_1 = arith.constant 0 : i32
    %c0_i32_2 = arith.constant 0 : i32
    return %arg0, %c0_i32, %c0_i32_0, %c0_i32_1 : i32, i32, i32, i32
  }
  func.func @transform_2(%arg0: i32) -> (i32, i32, i32, i32) {
    %c0_i32 = arith.constant 0 : i32
    %c0_i32_0 = arith.constant 0 : i32
    %c0_i32_1 = arith.constant 0 : i32
    %c0_i32_2 = arith.constant 0 : i32
    return %arg0, %c0_i32, %c0_i32_0, %c0_i32_1 : i32, i32, i32, i32
  }
}

</mosaic_0001>

<bundles_post_ra>
// kernel: spatial_attention.1
= control target key start
LH: loop header
LB: loop body
LE: loop exit
PB: predicated region body
PF: predicated region fallthrough
CT: control target
= control target key end

     0   :  { %7 = vsyncpa [#allocation6], 0  ;;  %s2793_s0 = inlined_call_operand.vmem [shape: f32[98], index: 0, kind: input, shape index: {}]   ;;  %s2794_s1 = inlined_call_operand.hbm [shape: f32[2,4,16,16], index: 1, kind: input, shape index: {}]   ;;  %s2795_s2 = inlined_call_operand.hbm [shape: f32[2,1,16,16], index: 2, kind: output, shape index: {}]  }
   0x1   :  { %8 = vsyncpa [#allocation4], 0 }
   0x2   :  { %10 = vsyncpa [#allocation4 + $0x1], 0 }
   0x3   :  { %11 = vsyncpa [#allocation5], 0 }
   0x4   :  { %13 = vsyncpa [#allocation5 + $0x1], 0  ;;  %s1984_s9 = smov 0   ;;  %s1986_s10 = smov 0  }
   0x5   :  { %s1988_s11 = smov 0   ;;  %s1990_s12 = smov 0  }
   0x6 LB: > { %s2005_s13 = sadd.s32 4294967295, %s1952_s12   ;;  %s1647_s14 = sadd.s32 4294967294, %s1952_s12   ;;  %s1952_s12 = sphi %s1990_s12, %s2817_s12   ;;  %s1948_s11 = sphi %s1988_s11, %s2816_s11   ;;  %s1944_s10 = sphi %s1986_s10, %s2815_s10   ;;  %s1940_s9 = sphi %s1984_s9, %s2814_s9  }
   0x7   : > { %s2009_s15 = sadd.s32 1, %s1952_s12   ;;  %s47_s16 = sadd.s32 1, %s1948_s11 }
   0x8   : > { %s44_s17 = ssub.s32 %s1952_s12, %s2009_s15  ;;  %p54_p0 = scmp.ne.s32.totalorder %s1948_s11, %s1944_s10 }
   0x9   : > { %p45_p1 = scmp.eq.s32.totalorder %s44_s17, 0  ;;  %p55_p2 = scmp.eq.s32.totalorder %s1952_s12, 0 }
   0xa   : > { %p60_p3 = scmp.ne.s32.totalorder %s1944_s10, %s1940_s9  ;;  %p2797_p4 = scmp.eq.s32.totalorder %s2005_s13, 0 }
   0xb   : > { %s2021_s18 = scalar_select %p45_p1, %s1948_s11, %s47_s16  }
   0xc   : > { %p2023_p5 = por %p55_p2, %p54_p0  ;;  %p2029_p6 = por %p2797_p4, %p60_p3 }
   0xd   : > { %p84_p7 = scmp.eq.s32.totalorder %s2005_s13, 1  ;;  %p90_p8 = scmp.eq.s32.totalorder %s1647_s14, 1 }
   0xe   : > { %s2801_s20 = scalar_select %p2029_p6, 1, 0 }
   0xf   : > { %p1648_p9 = scmp.ge.s32.totalorder %s1952_s12, 1  ;;  %p97_p10 = scmp.lt.s32.totalorder %s1952_s12, 3 }
  0x10   : > { %p2036_p11 = por %p84_p7, %p54_p0  ;;  %p2040_p12 = por %p90_p8, %p60_p3 }
  0x11   : > { %p2044_p13 = pnand %p1648_p9, %p97_p10  ;;  %s110_s26 = sshll.u32 %s2793_s0, 4  ;;  %s111_s26 = int_to_ptr.vmem [resolvable:$true] %s110_s26 }
  0x12   : > { %s2802_s21 = scalar_select %p2036_p11, 1, 0 }
  0x13   : > { %s2803_s22 = scalar_select %p2040_p12, 1, 0 }
  0x14   : > { %s2804_s23 = scalar_select %p2044_p13, 1, 0 }
  0x15   : > { %p1772_p1 = pneg %p2044_p13  ;;  %p1785_p2 = scmp.lt.s32.totalorder %s1952_s12, 2 }
  0x16   : > { %s121_s28 = sand.u32 1, %s1948_s11   ;;  %s1841_s3 = scalar_lea.vmem %s111_s26, 16 }
  0x17   : > { %p2057_p7 = pnand %p1772_p1, %p2797_p4  ;;  %p2064_p3 = pnand %p1785_p2, %p2023_p5 }
  0x18   : > { %s1651_s30 = sshll.u32 %s121_s28, 6  ;;  %p1842_p8 = scmp.ne.s32.totalorder %s111_s26, %s1841_s3 }
  0x19   : > { %p1843_p9 = pneg %p2057_p7  ;;  %p1849_p12 = scmp.lt.s32.totalorder %s111_s26, %s111_s26 }
  0x1a   : > { %p1850_p11 = scmp.lt.s32.totalorder %s1841_s3, %s1841_s3 }
  0x1b   : > { %p1844_p10 = pnand %p1843_p9, %p1842_p8 }
  0x1c   : > { %p1851_p1 = por %p1850_p11, %p1849_p12 }
  0x1d   : > { %p1845_p0 = pneg %p1844_p10 }
  0x1f   : > { %p1852_p4 = pnand %p1851_p1, %p1845_p0 }
  0x21   : > { %1855 = shalt.err (!%p1852_p4)
}
  0x22   : > { %s1954_s4 = smov [#allocation3]   ;;  %s1762_s5 = sshll.u32 %s1952_s12, 10 }
  0x23   : > { %1775 = dma.vmem_to_smem (!%p2057_p7), %s111_s26, 16, %s1954_s4, [#allocation6]  }
  0x24   : > { %s125_s6 = scalar_lea.vmem [#allocation7], %s1651_s30  ;;  %s2076_s16 = scalar_lea.hbm %s2794_s1, %s1762_s5 }
  0x25   : > { %s132_s7 = sshll.u32 %s125_s6, 4  ;;  %s2080_s17 = scalar_lea.sflag [#allocation4], %s121_s28  ;;  %s2078_s7 = int_to_ptr.vmem [resolvable:$true] %s132_s7 }
  0x26   : > { %s1856_s19 = scalar_lea.hbm %s2076_s16, 1024  ;;  %p1858_p5 = pneg %p2064_p3 }
  0x27   : > { %p1857_p4 = scmp.ne.s32.totalorder %s2076_s16, %s1856_s19  ;;  %s1861_s26 = scalar_lea.hbm %s2794_s1, 2048 }
  0x28   : > { %p1862_p0 = scmp.lt.s32.totalorder %s2076_s16, %s2794_s1  ;;  %p1863_p2 = scmp.lt.s32.totalorder %s1861_s26, %s1856_s19 }
  0x29   : > { %p1859_p11 = pnand %p1858_p5, %p1857_p4 }
  0x2a   : > { %p1864_p7 = por %p1863_p2, %p1862_p0 }
  0x2b   : > { %p1860_p12 = pneg %p1859_p11 }
  0x2d   : > { %p1865_p8 = pnand %p1864_p7, %p1860_p12 }
  0x2f   : > { %1868 = shalt.err (!%p1865_p8)
}
  0x30   : > { %s1869_s28 = scalar_lea.vmem %s2078_s7, 1024  ;;  %s1955_s3 = smov [#allocation7]  }
  0x31   : > { %p1870_p9 = scmp.ne.s32.totalorder %s2078_s7, %s1869_s28  ;;  %s1874_s4 = sshll.u32 %s1955_s3, 4  ;;  %s1875_s4 = int_to_ptr.vmem [resolvable:$false] %s1874_s4 }
  0x32   : > { %s1876_s5 = scalar_lea.vmem %s1875_s4, 2048  ;;  %p1877_p4 = scmp.lt.s32.totalorder %s2078_s7, %s1875_s4 }
  0x33   : > { %p1872_p10 = pnand %p1870_p9, %p1858_p5  ;;  %p1878_p11 = scmp.lt.s32.totalorder %s1876_s5, %s1869_s28 }
  0x35   : > { %p1873_p1 = pneg %p1872_p10  ;;  %p1879_p6 = por %p1878_p11, %p1877_p4 }
  0x37   : > { %p1880_p13 = pnand %p1879_p6, %p1873_p1 }
  0x39   : > { %1883 = shalt.err (!%p1880_p13)
}
  0x3a   : > { %s1956_s6 = smov 128   ;;  %s1957_s8 = smov 8  }
  0x3b   : > { %1779 = dma.hbm_to_vmem [thread:$0]  (!%p2064_p3), %s2076_s16, 1024, %s2078_s7, %s2080_s17, %s1956_s6, %s1956_s6, %s1957_s8  }
  0x3c   : > { %p2807_p5 = scmp.ne.s32.totalorder %s2804_s23, 0 }
  0x3d   : > { %p2808_p12 = scmp.eq.s32.totalorder (!%p2807_p5), %s2005_s13, 0 }
  0x3e   : > { %144 = sbr.rel (%p2807_p5) target bundleno = 708 (0x2c4), region = 28 }
  0x43   : > { %1927 = dma.done.wait (%p2808_p12), [#allocation6], 16   ;;  %p2809_p0 = pmov %p2808_p12 }
  0x44   : > { %s2108_s14 = sand.u32 1, %s1944_s10   ;;  %p2810_p6 = scmp.ne.s32.totalorder %s2801_s20, 0 }
  0x45   : > { %1929 = vsyncadd (%p2809_p0), [#allocation6], 4294967280  ;;  %s1656_s19 = sshll.u32 %s2108_s14, 6  ;;  %s151_s24 = scalar_lea.sflag [#allocation4], %s2108_s14 }
  0x46   : > { %s154_s25 = scalar_lea.vmem [#allocation7], %s1656_s19 }
  0x47   : > { %1931 = dma.done.wait (%p2810_p6), %s151_s24, 1024  }
  0x48   : > { %1933 = vsyncadd (%p2810_p6), %s151_s24, 4294966272 }
  0x49   : > { %159 = sfence }
  0x4a   : > { %v184_v0 = vld [vmem:[%s154_s25] sm:$0xff]  ;;  %v186_v1 = vld [vmem:[%s154_s25 + $0x10] sm:$0xff]  ;;  %vm192_vm0 = vcmask 130048   ;;  %v185_v7 = vld [vmem:[%s154_s25 + $0x8] sm:$0xff]  ;;  %vm176_vm1 = vcmask 179200   ;;  %v1958_v22 = vmov 0.0  }
  0x4b   : > { %v188_v2 = vld [vmem:[%s154_s25 + $0x20] sm:$0xff]  ;;  %v190_v3 = vld [vmem:[%s154_s25 + $0x30] sm:$0xff]  ;;  %v193_v4 = vsel %vm192_vm0, %v184_v0, 0.0  ;;  %v194_v5 = vsel %vm192_vm0, %v186_v1, 0.0  ;;  %v187_v8 = vld [vmem:[%s154_s25 + $0x18] sm:$0xff]  ;;  %v200_v13 = vsel %vm192_vm0, %v185_v7, 0.0 }
  0x4c   : > { %v196_v6 = vsel %vm192_vm0, %v188_v2, 0.0  ;;  %v195_v9 = vadd.f32 %v194_v5, %v193_v4  ;;  %v198_v10 = vsel %vm192_vm0, %v190_v3, 0.0  ;;  %v189_v11 = vld [vmem:[%s154_s25 + $0x28] sm:$0xff]  ;;  %v191_v12 = vld [vmem:[%s154_s25 + $0x38] sm:$0xff]  ;;  %v201_v14 = vsel %vm192_vm0, %v187_v8, 0.0  ;;  %177 = vst.msk [vmem:[#allocation2] sm:$0xff] %vm176_vm1, %v1958_v22 }
  0x4d   : > { %v202_v15 = vadd.f32 %v201_v14, %v200_v13  ;;  %v203_v16 = vsel %vm192_vm0, %v189_v11, 0.0  ;;  %v205_v17 = vsel %vm192_vm0, %v191_v12, 0.0  ;;  %v221_v19 = vsel %vm192_vm0, %v184_v0, -inf  ;;  %178 = vst.msk [vmem:[#allocation2 + $0x8] sm:$0xff] %vm176_vm1, %v1958_v22  ;;  %181 = vst.msk [vmem:[#allocation2 + $0x18] sm:$0xff] %vm176_vm1, %v1958_v22  ;;  %s1959_s20 = smov 3  }
  0x4e   : > { %v197_v18 = vadd.f32 %v196_v6, %v195_v9  ;;  %v222_v20 = vsel %vm192_vm0, %v186_v1, -inf  ;;  %182 = vst.msk [vmem:[#allocation2 + $0x20] sm:$0xff] %vm176_vm1, %v1958_v22  ;;  %v223_v23 = vsel %vm192_vm0, %v188_v2, -inf  ;;  %v225_v24 = vsel %vm192_vm0, %v190_v3, -inf  ;;  %s1658_s23 = sld [smem:[#allocation3 + $0x1]]  ;;  %s1960_s17 = smov 127  }
  0x4f   : > { %v204_v21 = vadd.f32 %v203_v16, %v202_v15  ;;  %vm179_vm2 = vcmask 177152   ;;  %v224_v26 = vmax.f32 %v221_v19, %v223_v23  ;;  %v226_v27 = vmax.f32 %v222_v20, %v225_v24  ;;  %s1659_s29 = sld [smem:[#allocation3 + $0x2]]  ;;  %s1961_s27 = smov 126  }
  0x50   : > { %v199_v25 = vadd.f32 %v198_v10, %v197_v18  ;;  %180 = vst.msk [vmem:[#allocation2 + $0x10] sm:$0x3f] %vm179_vm2, %v1958_v22  ;;  %183 = vst.msk [vmem:[#allocation2 + $0x28] sm:$0x3f] %vm179_vm2, %v1958_v22  ;;  %v228_v28 = vsel %vm192_vm0, %v185_v7, -inf  ;;  %v229_v30 = vsel %vm192_vm0, %v187_v8, -inf }
  0x51   : > { %v206_v29 = vadd.f32 %v205_v17, %v204_v21  ;;  %v230_v31 = vsel %vm192_vm0, %v189_v11, -inf  ;;  %v232_v32 = vsel %vm192_vm0, %v191_v12, -inf  ;;  %v227_v34 = vmax.f32 %v224_v26, %v226_v27  ;;  %s1660_s7 = sld [smem:[#allocation3 + $0x3]]  ;;  %s1962_s28 = smov 125  }
  0x52   : > { %v208_v33 = vmul.f32 0.25, %v199_v25  ;;  %v231_v35 = vmax.f32 %v228_v28, %v230_v31  ;;  %v233_v36 = vmax.f32 %v229_v30, %v232_v32  ;;  %vm218_vm3 = vcmask 154648   ;;  %s1661_s16 = sld [smem:[#allocation3 + $0x4]]  ;;  %s1963_s4 = smov 124  }
  0x53   : > { %v209_v37 = vmul.f32 0.25, %v206_v29  ;;  %237 = vrot.lane.b32.xlu1 %v227_v34, %s1959_s20  ;;  %s1662_s26 = sld [smem:[#allocation3 + $0x5]]  ;;  %s1964_s6 = smov 123  }
  0x54   : > { %212 = vrot.lane.b32.xlu0 %v208_v33, %s1959_s20  ;;  %v234_v38 = vmax.f32 %v231_v35, %v233_v36  ;;  %v255_v43 = vstv %s1658_s23  ;;  %s1663_s30 = sld [smem:[#allocation3 + $0x6]]  ;;  %s1965_s19 = smov 122  }
  0x55   : > { %v269_v46 = vstv %s1659_s29  ;;  %s1665_s3 = sld [smem:[#allocation3 + $0x8]]  ;;  %p2811_p3 = scmp.ne.s32.totalorder %s2802_s21, 0 }
  0x56   : > { %s1666_s5 = sld [smem:[#allocation3 + $0x9]] }
  0x57   : > { %239 = vrot.lane.b32.xlu1 %v234_v38, %s1959_s20  ;;  %v283_v50 = vstv %s1660_s7  ;;  %s1667_s8 = sld [smem:[#allocation3 + $0xa]] }
  0x58   : > { %214 = vrot.lane.b32.xlu0 %v209_v37, %s1959_s20  ;;  %v297_v53 = vstv %s1661_s16  ;;  %s1668_s24 = sld [smem:[#allocation3 + $0xb]] }
  0x59   : > { %v311_v56 = vstv %s1662_s26  ;;  %s1669_s25 = sld [smem:[#allocation3 + $0xc]] }
  0x5a   : > { %v325_v59 = vstv %s1663_s30  ;;  %s1670_s20 = sld [smem:[#allocation3 + $0xd]] }
  0x5b   : > { %v347_v63 = vstv %s1665_s3  ;;  %s1672_s23 = sld [smem:[#allocation3 + $0xf]] }
  0x5c   : > { %v361_v3 = vstv %s1666_s5  ;;  %s1673_s29 = sld [smem:[#allocation3 + $0x10]] }
  0x5d   : > { %v375_v6 = vstv %s1667_s8  ;;  %s1674_s7 = sld [smem:[#allocation3 + $0x11]] }
  0x5e   : > { %v389_v9 = vstv %s1668_s24  ;;  %s1675_s16 = sld [smem:[#allocation3 + $0x12]] }
  0x5f   : > { %v403_v12 = vstv %s1669_s25  ;;  %s1676_s26 = sld [smem:[#allocation3 + $0x13]] }
  0x60   : > { %v417_v15 = vstv %s1670_s20  ;;  %s1677_s30 = sld [smem:[#allocation3 + $0x14]] }
  0x61   : > { %v439_v19 = vstv %s1672_s23  ;;  %s1679_s3 = sld [smem:[#allocation3 + $0x16]] }
  0x62   : > { %v453_v23 = vstv %s1673_s29  ;;  %s1680_s5 = sld [smem:[#allocation3 + $0x17]] }
  0x63   : > { %v467_v26 = vstv %s1674_s7  ;;  %s1681_s8 = sld [smem:[#allocation3 + $0x18]] }
  0x64   : > { %v481_v29 = vstv %s1675_s16  ;;  %s1682_s24 = sld [smem:[#allocation3 + $0x19]] }
  0x65   : > { %v495_v32 = vstv %s1676_s26  ;;  %s1683_s25 = sld [smem:[#allocation3 + $0x1a]] }
  0x66   : > { %v509_v35 = vstv %s1677_s30  ;;  %s1684_s20 = sld [smem:[#allocation3 + $0x1b]] }
  0x67   : > { %s1686_s23 = sld [smem:[#allocation3 + $0x1d]] }
  0x68   : > { %s1687_s29 = sld [smem:[#allocation3 + $0x1e]] }
  0x69   : > { %s1688_s7 = sld [smem:[#allocation3 + $0x1f]] }
  0x6a   : > { %s1689_s16 = sld [smem:[#allocation3 + $0x20]] }
  0x6b   : > { %s1690_s26 = sld [smem:[#allocation3 + $0x21]] }
  0x6c   : > { %s1691_s30 = sld [smem:[#allocation3 + $0x22]] }
  0xc5   : > { %v238_v40 = vpop.permute.xlu1 %237 }
  0xc6   : > { %v213_v39 = vpop.permute.xlu0 %212  ;;  %244 = vst.msk [vmem:[#allocation2 + $0x1b] sm:$0xff] %vm218_vm3, %v238_v40 }
  0xc7   : > { %219 = vst.msk [vmem:[#allocation2 + $0x3] sm:$0xff] %vm218_vm3, %v213_v39  ;;  %v531_v39 = vstv %s1679_s3  ;;  %s1693_s3 = sld [smem:[#allocation3 + $0x24]] }
  0xc9   : > { %v240_v42 = vpop.permute.xlu1 %239 }
  0xca   : > { %v215_v41 = vpop.permute.xlu0 %214  ;;  %245 = vst.msk [vmem:[#allocation2 + $0x23] sm:$0xff] %vm218_vm3, %v240_v42 }
  0xcb   : > { %220 = vst.msk [vmem:[#allocation2 + $0xb] sm:$0xff] %vm218_vm3, %v215_v41 }
  0xce   : > { %v2132_v44 = vld [vmem:[#allocation2] sm:$0xff] }
  0xcf   : > { %v256_v45 = vmul.f32 %v255_v43, %v2132_v44  ;;  %v270_v49 = vmul.f32 %v269_v46, %v2132_v44  ;;  %v284_v52 = vmul.f32 %v283_v50, %v2132_v44  ;;  %v298_v55 = vmul.f32 %v297_v53, %v2132_v44  ;;  %v2156_v62 = vld [vmem:[#allocation2 + $0x1] sm:$0xff] }
  0xd0   : > { %v312_v58 = vmul.f32 %v311_v56, %v2132_v44  ;;  %v326_v61 = vmul.f32 %v325_v59, %v2132_v44  ;;  %v348_v1 = vmul.f32 %v347_v63, %v2156_v62  ;;  %v362_v5 = vmul.f32 %v361_v3, %v2156_v62  ;;  %v2184_v18 = vld [vmem:[#allocation2 + $0x2] sm:$0xff] }
  0xd1   : > { %260 = vrot.lane.b32.xlu0 %v256_v45, %s1960_s17  ;;  %v376_v8 = vmul.f32 %v375_v6, %v2156_v62  ;;  %v390_v11 = vmul.f32 %v389_v9, %v2156_v62  ;;  %v404_v14 = vmul.f32 %v403_v12, %v2156_v62  ;;  %v418_v17 = vmul.f32 %v417_v15, %v2156_v62  ;;  %v2212_v38 = vld [vmem:[#allocation2 + $0x3] sm:$0xff] }
  0xd2   : > { %v2136_v47 = vld [vmem:[#allocation2 + $0x8] sm:$0xff]  ;;  %v440_v21 = vmul.f32 %v439_v19, %v2184_v18  ;;  %v454_v25 = vmul.f32 %v453_v23, %v2184_v18  ;;  %v468_v28 = vmul.f32 %v467_v26, %v2184_v18  ;;  %v482_v31 = vmul.f32 %v481_v29, %v2184_v18 }
  0xd3   : > { %v257_v48 = vmul.f32 %v255_v43, %v2136_v47  ;;  %v271_v51 = vmul.f32 %v269_v46, %v2136_v47  ;;  %v285_v54 = vmul.f32 %v283_v50, %v2136_v47  ;;  %v299_v57 = vmul.f32 %v297_v53, %v2136_v47  ;;  %v2162_v2 = vld [vmem:[#allocation2 + $0x9] sm:$0xff] }
  0xd4   : > { %v313_v60 = vmul.f32 %v311_v56, %v2136_v47  ;;  %v327_v0 = vmul.f32 %v325_v59, %v2136_v47  ;;  %v349_v4 = vmul.f32 %v347_v63, %v2162_v2  ;;  %v363_v7 = vmul.f32 %v361_v3, %v2162_v2  ;;  %v2190_v22 = vld [vmem:[#allocation2 + $0xa] sm:$0xff] }
  0xd5   : > { %262 = vrot.lane.b32.xlu1 %v257_v48, %s1960_s17  ;;  %274 = vrot.lane.b32.xlu0 %v270_v49, %s1961_s27  ;;  %v377_v10 = vmul.f32 %v375_v6, %v2162_v2  ;;  %v391_v13 = vmul.f32 %v389_v9, %v2162_v2  ;;  %v405_v16 = vmul.f32 %v403_v12, %v2162_v2  ;;  %v2218_v42 = vld [vmem:[#allocation2 + $0xb] sm:$0xff]  ;;  %v545_v43 = vstv %s1680_s5  ;;  %s2264_s5 = sld [smem:[#allocation3 + $0x25]] }
  0xd6   : > { %v419_v20 = vmul.f32 %v417_v15, %v2162_v2  ;;  %v441_v24 = vmul.f32 %v439_v19, %v2190_v22  ;;  %v455_v27 = vmul.f32 %v453_v23, %v2190_v22  ;;  %v469_v30 = vmul.f32 %v467_v26, %v2190_v22 }
  0xd7   : > { %v483_v33 = vmul.f32 %v481_v29, %v2190_v22  ;;  %v496_v34 = vmul.f32 %v495_v32, %v2184_v18  ;;  %v497_v36 = vmul.f32 %v495_v32, %v2190_v22  ;;  %v510_v37 = vmul.f32 %v509_v35, %v2184_v18 }
  0xd8   : > { %v511_v40 = vmul.f32 %v509_v35, %v2190_v22  ;;  %v532_v41 = vmul.f32 %v531_v39, %v2212_v38  ;;  %v533_v45 = vmul.f32 %v531_v39, %v2218_v42  ;;  %v546_v46 = vmul.f32 %v545_v43, %v2212_v38 }
  0xd9   : > { %276 = vrot.lane.b32.xlu1 %v271_v51, %s1961_s27  ;;  %288 = vrot.lane.b32.xlu0 %v284_v52, %s1962_s28  ;;  %v559_v48 = vstv %s1681_s8  ;;  %v547_v49 = vmul.f32 %v545_v43, %v2218_v42  ;;  %v573_v51 = vstv %s1682_s24  ;;  %s2266_s8 = sld [smem:[#allocation3]] }
  0xda   : > { %v560_v50 = vmul.f32 %v559_v48, %v2212_v38  ;;  %v561_v52 = vmul.f32 %v559_v48, %v2218_v42  ;;  %v574_v53 = vmul.f32 %v573_v51, %v2212_v38  ;;  %v637_v3 = vstv %s1687_s29  ;;  %s2274_s24 = sld [smem:[#allocation3 + $0x26]] }
  0xdb   : > { %v651_v6 = vstv %s1688_s7  ;;  %v665_v9 = vstv %s1689_s16  ;;  %v679_v12 = vstv %s1690_s26  ;;  %v693_v15 = vstv %s1691_s30  ;;  %s2302_s29 = sld [smem:[#allocation3 + $0x29]] }
  0xdc   : > { %s2309_s7 = sld [smem:[#allocation3 + $0x2b]] }
  0xdd   : > { %290 = vrot.lane.b32.xlu1 %v285_v54, %s1962_s28  ;;  %302 = vrot.lane.b32.xlu0 %v298_v55, %s1963_s4  ;;  %v587_v54 = vstv %s1683_s25  ;;  %v575_v55 = vmul.f32 %v573_v51, %v2218_v42  ;;  %s2283_s25 = sld [smem:[#allocation3 + $0x27]] }
  0xde   : > { %v588_v56 = vmul.f32 %v587_v54, %v2212_v38  ;;  %s2318_s16 = sld [smem:[#allocation3 + $0x2c]] }
  0xdf   : > { %v249_v29 = vstv %s2266_s8  ;;  %s2328_s26 = sld [smem:[#allocation3 + $0x2d]] }
  0xe0   : > { %v743_v35 = vstv %s2274_s24  ;;  %v251_v43 = vmul.f32 %v249_v29, %v2136_v47  ;;  %s2337_s30 = sld [smem:[#allocation3 + $0x2e]] }
  0xe1   : > { %304 = vrot.lane.b32.xlu1 %v299_v57, %s1963_s4  ;;  %316 = vrot.lane.b32.xlu0 %v312_v58, %s1964_s6  ;;  %v601_v57 = vstv %s1684_s20  ;;  %v589_v58 = vmul.f32 %v587_v54, %v2218_v42  ;;  %s2292_s20 = sld [smem:[#allocation3 + $0x28]] }
  0xe2   : > { %v602_v59 = vmul.f32 %v601_v57, %v2212_v38  ;;  %v603_v63 = vmul.f32 %v601_v57, %v2218_v42  ;;  %s2353_s8 = sld [smem:[#allocation3 + $0x30]] }
  0xe3   : > { %s2360_s24 = sld [smem:[#allocation3 + $0x32]] }
  0xe5   : > { %318 = vrot.lane.b32.xlu1 %v313_v60, %s1964_s6  ;;  %330 = vrot.lane.b32.xlu0 %v326_v61, %s1965_s19  ;;  %v2240_v60 = vld [vmem:[#allocation2 + $0x4] sm:$0xff]  ;;  %v623_v61 = vstv %s1686_s23  ;;  %s2294_s23 = sld [smem:[#allocation3 + $0x7]] }
  0xe6   : > { %v694_v19 = vmul.f32 %v693_v15, %v2240_v60 }
  0xe7   : > { %v771_v54 = vstv %s2292_s20  ;;  %s2379_s20 = sld [smem:[#allocation3 + $0x34]] }
  0xe9   : > { %332 = vrot.lane.b32.xlu1 %v327_v0, %s1965_s19  ;;  %352 = vrot.lane.b32.xlu0 %v348_v1, %s1960_s17  ;;  %v624_v0 = vmul.f32 %v623_v61, %v2240_v60  ;;  %v2246_v1 = vld [vmem:[#allocation2 + $0xc] sm:$0xff] }
  0xed   : > { %354 = vrot.lane.b32.xlu1 %v349_v4, %s1960_s17  ;;  %366 = vrot.lane.b32.xlu0 %v362_v5, %s1961_s27  ;;  %v625_v4 = vmul.f32 %v623_v61, %v2246_v1  ;;  %v638_v5 = vmul.f32 %v637_v3, %v2240_v60 }
  0xf1   : > { %368 = vrot.lane.b32.xlu1 %v363_v7, %s1961_s27  ;;  %380 = vrot.lane.b32.xlu0 %v376_v8, %s1962_s28  ;;  %v639_v7 = vmul.f32 %v637_v3, %v2246_v1  ;;  %v652_v8 = vmul.f32 %v651_v6, %v2240_v60 }
  0xf5   : > { %382 = vrot.lane.b32.xlu1 %v377_v10, %s1962_s28  ;;  %394 = vrot.lane.b32.xlu0 %v390_v11, %s1963_s4  ;;  %v653_v10 = vmul.f32 %v651_v6, %v2246_v1  ;;  %v666_v11 = vmul.f32 %v665_v9, %v2240_v60 }
  0xf9   : > { %396 = vrot.lane.b32.xlu1 %v391_v13, %s1963_s4  ;;  %408 = vrot.lane.b32.xlu0 %v404_v14, %s1964_s6  ;;  %v667_v13 = vmul.f32 %v665_v9, %v2246_v1  ;;  %v680_v14 = vmul.f32 %v679_v12, %v2240_v60 }
  0xfd   : > { %410 = vrot.lane.b32.xlu1 %v405_v16, %s1964_s6  ;;  %422 = vrot.lane.b32.xlu0 %v418_v17, %s1965_s19  ;;  %v681_v17 = vmul.f32 %v679_v12, %v2246_v1  ;;  %v2325_v12 = vld [vmem:[#allocation2 + $0x6] sm:$0xff] }
 0x101   : > { %424 = vrot.lane.b32.xlu1 %v419_v20, %s1965_s19  ;;  %444 = vrot.lane.b32.xlu0 %v440_v21, %s1960_s17  ;;  %v2272_v20 = vld [vmem:[#allocation2 + $0x5] sm:$0xff]  ;;  %v715_v21 = vstv %s1693_s3  ;;  %s2344_s3 = sld [smem:[#allocation3 + $0x2f]] }
 0x102   : > { %v716_v26 = vmul.f32 %v715_v21, %v2272_v20 }
 0x105   : > { %446 = vrot.lane.b32.xlu1 %v441_v24, %s1960_s17  ;;  %458 = vrot.lane.b32.xlu0 %v454_v25, %s1961_s27  ;;  %v695_v25 = vmul.f32 %v693_v15, %v2246_v1 }
 0x109   : > { %460 = vrot.lane.b32.xlu1 %v455_v27, %s1961_s27  ;;  %472 = vrot.lane.b32.xlu0 %v468_v28, %s1962_s28  ;;  %v2280_v27 = vld [vmem:[#allocation2 + $0xd] sm:$0xff]  ;;  %v729_v28 = vstv %s2264_s5  ;;  %s2346_s5 = sld [smem:[#allocation3 + $0xe]] }
 0x10a   : > { %v717_v32 = vmul.f32 %v715_v21, %v2280_v27  ;;  %v745_v51 = vmul.f32 %v743_v35, %v2280_v27 }
 0x10d   : > { %474 = vrot.lane.b32.xlu1 %v469_v30, %s1962_s28  ;;  %486 = vrot.lane.b32.xlu0 %v482_v31, %s1963_s4 }
 0x111   : > { %488 = vrot.lane.b32.xlu1 %v483_v33, %s1963_s4  ;;  %500 = vrot.lane.b32.xlu0 %v496_v34, %s1964_s6  ;;  %v730_v33 = vmul.f32 %v729_v28, %v2272_v20  ;;  %v250_v34 = vmul.f32 %v249_v29, %v2132_v44  ;;  %v835_v29 = vstv %s2328_s26  ;;  %s2411_s26 = sld [smem:[#allocation3 + $0x39]] }
 0x115   : > { %502 = vrot.lane.b32.xlu1 %v497_v36, %s1964_s6  ;;  %514 = vrot.lane.b32.xlu0 %v510_v37, %s1965_s19 }
 0x119   : > { %516 = vrot.lane.b32.xlu1 %v511_v40, %s1965_s19  ;;  %536 = vrot.lane.b32.xlu0 %v532_v41, %s1960_s17  ;;  %v731_v40 = vmul.f32 %v729_v28, %v2280_v27  ;;  %v744_v41 = vmul.f32 %v743_v35, %v2272_v20 }
 0x11d   : > { %538 = vrot.lane.b32.xlu1 %v533_v45, %s1960_s17  ;;  %550 = vrot.lane.b32.xlu0 %v546_v46, %s1961_s27  ;;  %v757_v45 = vstv %s2283_s25  ;;  %s2369_s25 = sld [smem:[#allocation3 + $0x33]] }
 0x11e   : > { %v759_v61 = vmul.f32 %v757_v45, %v2280_v27 }
 0x121   : > { %552 = vrot.lane.b32.xlu1 %v547_v49, %s1961_s27  ;;  %564 = vrot.lane.b32.xlu0 %v560_v50, %s1962_s28 }
 0x125   : > { %566 = vrot.lane.b32.xlu1 %v561_v52, %s1962_s28  ;;  %578 = vrot.lane.b32.xlu0 %v574_v53, %s1963_s4  ;;  %v758_v52 = vmul.f32 %v757_v45, %v2272_v20 }
 0x129   : > { %580 = vrot.lane.b32.xlu1 %v575_v55, %s1963_s4  ;;  %592 = vrot.lane.b32.xlu0 %v588_v56, %s1964_s6  ;;  %v341_v55 = vstv %s2294_s23  ;;  %s2388_s23 = sld [smem:[#allocation3 + $0x35]] }
 0x12d   : > { %594 = vrot.lane.b32.xlu1 %v589_v58, %s1964_s6  ;;  %606 = vrot.lane.b32.xlu0 %v602_v59, %s1965_s19 }
 0x131   : > { %608 = vrot.lane.b32.xlu1 %v603_v63, %s1965_s19  ;;  %628 = vrot.lane.b32.xlu0 %v624_v0, %s1960_s17  ;;  %v772_v63 = vmul.f32 %v771_v54, %v2272_v20  ;;  %v342_v0 = vmul.f32 %v341_v55, %v2156_v62  ;;  %v343_v62 = vmul.f32 %v341_v55, %v2162_v2  ;;  %v821_v2 = vstv %s2318_s16  ;;  %s2404_s16 = sld [smem:[#allocation3 + $0x37]] }
 0x132   : > { %v822_v28 = vmul.f32 %v821_v2, %v2325_v12 }
 0x135   : > { %630 = vrot.lane.b32.xlu1 %v625_v4, %s1960_s17  ;;  %642 = vrot.lane.b32.xlu0 %v638_v5, %s1961_s27  ;;  %v785_v5 = vstv %s2302_s29  ;;  %s2395_s29 = sld [smem:[#allocation3 + $0x36]] }
 0x139   : > { %644 = vrot.lane.b32.xlu1 %v639_v7, %s1961_s27  ;;  %656 = vrot.lane.b32.xlu0 %v652_v8, %s1962_s28 }
 0x13d   : > { %658 = vrot.lane.b32.xlu1 %v653_v10, %s1962_s28  ;;  %670 = vrot.lane.b32.xlu0 %v666_v11, %s1963_s4  ;;  %v773_v10 = vmul.f32 %v771_v54, %v2280_v27  ;;  %v786_v11 = vmul.f32 %v785_v5, %v2272_v20 }
 0x141   : > { %672 = vrot.lane.b32.xlu1 %v667_v13, %s1963_s4  ;;  %684 = vrot.lane.b32.xlu0 %v680_v14, %s1964_s6  ;;  %v807_v14 = vstv %s2309_s7  ;;  %s2397_s7 = sld [smem:[#allocation3 + $0x15]] }
 0x142   : > { %v808_v21 = vmul.f32 %v807_v14, %v2325_v12 }
 0x143   : > { %v261_v16 = vpop.permute.xlu0 %260 }
 0x144   : > { %v266_v36 = vadd.f32 %v261_v16, %v250_v34  ;;  %v836_v34 = vmul.f32 %v835_v29, %v2325_v12 }
 0x145   : > { %686 = vrot.lane.b32.xlu1 %v681_v17, %s1964_s6  ;;  %698 = vrot.lane.b32.xlu0 %v694_v19, %s1965_s19  ;;  %v787_v19 = vmul.f32 %v785_v5, %v2280_v27 }
 0x147   : > { %v263_v23 = vpop.permute.xlu1 %262  ;;  %v275_v24 = vpop.permute.xlu0 %274 }
 0x148   : > { %v280_v44 = vadd.f32 %v275_v24, %v266_v36  ;;  %v267_v46 = vadd.f32 %v263_v23, %v251_v43  ;;  %v2334_v23 = vld [vmem:[#allocation2 + $0xe] sm:$0xff]  ;;  %v849_v36 = vstv %s2337_s30  ;;  %s2420_s30 = sld [smem:[#allocation3 + $0x3a]] }
 0x149   : > { %700 = vrot.lane.b32.xlu1 %v695_v25, %s1965_s19  ;;  %720 = vrot.lane.b32.xlu0 %v716_v26, %s1960_s17  ;;  %v809_v26 = vmul.f32 %v807_v14, %v2334_v23  ;;  %v837_v43 = vmul.f32 %v835_v29, %v2334_v23  ;;  %v941_v29 = vstv %s2388_s23  ;;  %s2471_s23 = sld [smem:[#allocation3 + $0x41]] }
 0x14b   : > { %v277_v30 = vpop.permute.xlu1 %276  ;;  %v289_v31 = vpop.permute.xlu0 %288 }
 0x14c   : > { %v294_v48 = vadd.f32 %v289_v31, %v280_v44  ;;  %v281_v53 = vadd.f32 %v277_v30, %v267_v46  ;;  %v850_v44 = vmul.f32 %v849_v36, %v2325_v12 }
 0x14d   : > { %722 = vrot.lane.b32.xlu1 %v717_v32, %s1960_s17  ;;  %734 = vrot.lane.b32.xlu0 %v730_v33, %s1961_s27  ;;  %v823_v33 = vmul.f32 %v821_v2, %v2334_v23 }
 0x14f   : > { %v291_v37 = vpop.permute.xlu1 %290  ;;  %v303_v39 = vpop.permute.xlu0 %302 }
 0x150   : > { %v308_v47 = vadd.f32 %v303_v39, %v294_v48  ;;  %v295_v56 = vadd.f32 %v291_v37, %v281_v53  ;;  %v863_v48 = vstv %s2344_s3  ;;  %s2430_s3 = sld [smem:[#allocation3 + $0x3b]] }
 0x151   : > { %736 = vrot.lane.b32.xlu1 %v731_v40, %s1961_s27  ;;  %748 = vrot.lane.b32.xlu0 %v744_v41, %s1962_s28  ;;  %v864_v54 = vmul.f32 %v863_v48, %v2325_v12 }
 0x153   : > { %v305_v49 = vpop.permute.xlu1 %304  ;;  %v317_v50 = vpop.permute.xlu0 %316 }
 0x154   : > { %v322_v57 = vadd.f32 %v317_v50, %v308_v47  ;;  %v309_v3 = vadd.f32 %v305_v49, %v295_v56  ;;  %v433_v49 = vstv %s2346_s5  ;;  %v851_v47 = vmul.f32 %v849_v36, %v2334_v23  ;;  %s2439_s5 = sld [smem:[#allocation3 + $0x3c]] }
 0x155   : > { %750 = vrot.lane.b32.xlu1 %v745_v51, %s1962_s28  ;;  %762 = vrot.lane.b32.xlu0 %v758_v52, %s1963_s4  ;;  %v434_v55 = vmul.f32 %v433_v49, %v2184_v18  ;;  %v435_v18 = vmul.f32 %v433_v49, %v2190_v22  ;;  %v913_v22 = vstv %s2369_s25  ;;  %s2455_s25 = sld [smem:[#allocation3 + $0x3e]] }
 0x157   : > { %v319_v58 = vpop.permute.xlu1 %318  ;;  %v331_v59 = vpop.permute.xlu0 %330 }
 0x158   : > { %v336_v4 = vadd.f32 %v331_v59, %v322_v57  ;;  %v323_v6 = vadd.f32 %v319_v58, %v309_v3  ;;  %v877_v58 = vstv %s2353_s8  ;;  %v865_v3 = vmul.f32 %v863_v48, %v2334_v23  ;;  %s2446_s8 = sld [smem:[#allocation3 + $0x3d]] }
 0x159   : > { %764 = vrot.lane.b32.xlu1 %v759_v61, %s1963_s4  ;;  %776 = vrot.lane.b32.xlu0 %v772_v63, %s1964_s6 }
 0x15a   : > { %v344_v7 = vadd.f32 %v342_v0, %v336_v4  ;;  %v878_v4 = vmul.f32 %v877_v58, %v2325_v12 }
 0x15b   : > { %v333_v8 = vpop.permute.xlu1 %332  ;;  %v353_v9 = vpop.permute.xlu0 %352 }
 0x15c   : > { %v337_v13 = vadd.f32 %v333_v8, %v323_v6  ;;  %v358_v30 = vadd.f32 %v353_v9, %v344_v7  ;;  %v2376_v6 = vld [vmem:[#allocation2 + $0x18] sm:$0xff]  ;;  %v899_v7 = vstv %s2360_s24  ;;  %s2448_s24 = sld [smem:[#allocation3 + $0x1c]] }
 0x15d   : > { %778 = vrot.lane.b32.xlu1 %v773_v10, %s1964_s6  ;;  %790 = vrot.lane.b32.xlu0 %v786_v11, %s1965_s19  ;;  %v879_v11 = vmul.f32 %v877_v58, %v2334_v23 }
 0x15e   : > { %v345_v15 = vadd.f32 %v343_v62, %v337_v13  ;;  %v900_v62 = vmul.f32 %v899_v7, %v2376_v6  ;;  %v2385_v13 = vld [vmem:[#allocation2 + $0x20] sm:$0xff] }
 0x15f   : > { %v355_v16 = vpop.permute.xlu1 %354  ;;  %v367_v17 = vpop.permute.xlu0 %366 }
 0x160   : > { %v372_v35 = vadd.f32 %v367_v17, %v358_v30  ;;  %v359_v37 = vadd.f32 %v355_v16, %v345_v15  ;;  %v901_v16 = vmul.f32 %v899_v7, %v2385_v13  ;;  %v914_v17 = vmul.f32 %v913_v22, %v2376_v6 }
 0x161   : > { %792 = vrot.lane.b32.xlu1 %v787_v19, %s1965_s19  ;;  %812 = vrot.lane.b32.xlu0 %v808_v21, %s1960_s17  ;;  %v927_v19 = vstv %s2379_s20  ;;  %s2462_s20 = sld [smem:[#allocation3 + $0x40]] }
 0x163   : > { %v369_v24 = vpop.permute.xlu1 %368  ;;  %v381_v25 = vpop.permute.xlu0 %380 }
 0x164   : > { %v386_v39 = vadd.f32 %v381_v25, %v372_v35  ;;  %v373_v45 = vadd.f32 %v369_v24, %v359_v37  ;;  %v915_v25 = vmul.f32 %v913_v22, %v2385_v13  ;;  %v942_v35 = vmul.f32 %v941_v29, %v2376_v6 }
 0x165   : > { %814 = vrot.lane.b32.xlu1 %v809_v26, %s1960_s17  ;;  %826 = vrot.lane.b32.xlu0 %v822_v28, %s1961_s27  ;;  %v928_v26 = vmul.f32 %v927_v19, %v2376_v6 }
 0x167   : > { %v383_v31 = vpop.permute.xlu1 %382  ;;  %v395_v32 = vpop.permute.xlu0 %394 }
 0x168   : > { %v400_v46 = vadd.f32 %v395_v32, %v386_v39  ;;  %v387_v50 = vadd.f32 %v383_v31, %v373_v45  ;;  %v955_v39 = vstv %s2395_s29  ;;  %s2481_s29 = sld [smem:[#allocation3 + $0x42]] }
 0x169   : > { %828 = vrot.lane.b32.xlu1 %v823_v33, %s1961_s27  ;;  %840 = vrot.lane.b32.xlu0 %v836_v34, %s1962_s28  ;;  %v929_v34 = vmul.f32 %v927_v19, %v2385_v13  ;;  %v956_v48 = vmul.f32 %v955_v39, %v2376_v6  ;;  %v1033_v19 = vstv %s2439_s5  ;;  %s2522_s5 = sld [smem:[#allocation3 + $0x48]] }
 0x16b   : > { %v397_v40 = vpop.permute.xlu1 %396  ;;  %v409_v41 = vpop.permute.xlu0 %408 }
 0x16c   : > { %v414_v51 = vadd.f32 %v409_v41, %v400_v46  ;;  %v401_v56 = vadd.f32 %v397_v40, %v387_v50  ;;  %v525_v40 = vstv %s2397_s7  ;;  %v943_v46 = vmul.f32 %v941_v29, %v2385_v13  ;;  %s2490_s7 = sld [smem:[#allocation3 + $0x43]] }
 0x16d   : > { %842 = vrot.lane.b32.xlu1 %v837_v43, %s1962_s28  ;;  %854 = vrot.lane.b32.xlu0 %v850_v44, %s1963_s4  ;;  %v526_v49 = vmul.f32 %v525_v40, %v2212_v38  ;;  %v527_v38 = vmul.f32 %v525_v40, %v2218_v42  ;;  %v1005_v42 = vstv %s2420_s30  ;;  %s2506_s30 = sld [smem:[#allocation3 + $0x45]] }
 0x16f   : > { %v411_v52 = vpop.permute.xlu1 %410  ;;  %v423_v53 = vpop.permute.xlu0 %422 }
 0x170   : > { %v428_v57 = vadd.f32 %v423_v53, %v414_v51  ;;  %v415_v59 = vadd.f32 %v411_v52, %v401_v56  ;;  %v969_v52 = vstv %s2404_s16  ;;  %v957_v56 = vmul.f32 %v955_v39, %v2385_v13  ;;  %s2497_s16 = sld [smem:[#allocation3 + $0x44]] }
 0x171   : > { %856 = vrot.lane.b32.xlu1 %v851_v47, %s1963_s4  ;;  %868 = vrot.lane.b32.xlu0 %v864_v54, %s1964_s6 }
 0x172   : > { %v436_v61 = vadd.f32 %v434_v55, %v428_v57  ;;  %v970_v57 = vmul.f32 %v969_v52, %v2376_v6 }
 0x173   : > { %v425_v63 = vpop.permute.xlu1 %424  ;;  %v445_v0 = vpop.permute.xlu0 %444 }
 0x174   : > { %v429_v5 = vadd.f32 %v425_v63, %v415_v59  ;;  %v450_v21 = vadd.f32 %v445_v0, %v436_v61  ;;  %v2427_v59 = vld [vmem:[#allocation2 + $0x19] sm:$0xff]  ;;  %v991_v61 = vstv %s2411_s26  ;;  %s2499_s26 = sld [smem:[#allocation3 + $0x23]] }
 0x175   : > { %870 = vrot.lane.b32.xlu1 %v865_v3, %s1964_s6  ;;  %882 = vrot.lane.b32.xlu0 %v878_v4, %s1965_s19  ;;  %v971_v4 = vmul.f32 %v969_v52, %v2385_v13 }
 0x176   : > { %v437_v8 = vadd.f32 %v435_v18, %v429_v5  ;;  %v992_v18 = vmul.f32 %v991_v61, %v2427_v59  ;;  %v2436_v5 = vld [vmem:[#allocation2 + $0x21] sm:$0xff] }
 0x177   : > { %v447_v9 = vpop.permute.xlu1 %446  ;;  %v459_v10 = vpop.permute.xlu0 %458 }
 0x178   : > { %v464_v28 = vadd.f32 %v459_v10, %v450_v21  ;;  %v451_v30 = vadd.f32 %v447_v9, %v437_v8  ;;  %v993_v9 = vmul.f32 %v991_v61, %v2436_v5  ;;  %v1006_v10 = vmul.f32 %v1005_v42, %v2427_v59 }
 0x179   : > { %884 = vrot.lane.b32.xlu1 %v879_v11, %s1965_s19  ;;  %904 = vrot.lane.b32.xlu0 %v900_v62, %s1960_s17  ;;  %v1019_v11 = vstv %s2430_s3  ;;  %s2513_s3 = sld [smem:[#allocation3 + $0x47]] }
 0x17b   : > { %v461_v14 = vpop.permute.xlu1 %460  ;;  %v473_v15 = vpop.permute.xlu0 %472 }
 0x17c   : > { %v478_v31 = vadd.f32 %v473_v15, %v464_v28  ;;  %v465_v36 = vadd.f32 %v461_v14, %v451_v30  ;;  %v1007_v15 = vmul.f32 %v1005_v42, %v2436_v5  ;;  %v1034_v28 = vmul.f32 %v1033_v19, %v2427_v59 }
 0x17d   : > { %906 = vrot.lane.b32.xlu1 %v901_v16, %s1960_s17  ;;  %918 = vrot.lane.b32.xlu0 %v914_v17, %s1961_s27  ;;  %v1020_v16 = vmul.f32 %v1019_v11, %v2427_v59 }
 0x17f   : > { %v475_v2 = vpop.permute.xlu1 %474  ;;  %v487_v24 = vpop.permute.xlu0 %486 }
 0x180   : > { %v492_v37 = vadd.f32 %v487_v24, %v478_v31  ;;  %v479_v41 = vadd.f32 %v475_v2, %v465_v36  ;;  %v1047_v31 = vstv %s2446_s8  ;;  %s2532_s8 = sld [smem:[#allocation3 + $0x49]] }
 0x181   : > { %920 = vrot.lane.b32.xlu1 %v915_v25, %s1961_s27  ;;  %932 = vrot.lane.b32.xlu0 %v928_v26, %s1962_s28  ;;  %v1021_v26 = vmul.f32 %v1019_v11, %v2436_v5  ;;  %v1048_v39 = vmul.f32 %v1047_v31, %v2427_v59  ;;  %v1125_v11 = vstv %s2490_s7  ;;  %s2573_s7 = sld [smem:[#allocation3 + $0x4f]] }
 0x183   : > { %v489_v32 = vpop.permute.xlu1 %488  ;;  %v501_v33 = vpop.permute.xlu0 %500 }
 0x184   : > { %v506_v43 = vadd.f32 %v501_v33, %v492_v37  ;;  %v493_v50 = vadd.f32 %v489_v32, %v479_v41  ;;  %v617_v32 = vstv %s2448_s24  ;;  %v1035_v37 = vmul.f32 %v1033_v19, %v2436_v5  ;;  %s2541_s24 = sld [smem:[#allocation3 + $0x4a]] }
 0x185   : > { %934 = vrot.lane.b32.xlu1 %v929_v34, %s1962_s28  ;;  %946 = vrot.lane.b32.xlu0 %v942_v35, %s1963_s4  ;;  %v618_v40 = vmul.f32 %v617_v32, %v2240_v60  ;;  %v619_v60 = vmul.f32 %v617_v32, %v2246_v1  ;;  %v1097_v1 = vstv %s2471_s23  ;;  %s2557_s23 = sld [smem:[#allocation3 + $0x4c]] }
 0x187   : > { %v503_v44 = vpop.permute.xlu1 %502  ;;  %v515_v45 = vpop.permute.xlu0 %514 }
 0x188   : > { %v520_v51 = vadd.f32 %v515_v45, %v506_v43  ;;  %v507_v53 = vadd.f32 %v503_v44, %v493_v50  ;;  %v1061_v44 = vstv %s2455_s25  ;;  %v1049_v50 = vmul.f32 %v1047_v31, %v2436_v5  ;;  %s2548_s25 = sld [smem:[#allocation3 + $0x4b]] }
 0x189   : > { %948 = vrot.lane.b32.xlu1 %v943_v46, %s1963_s4  ;;  %960 = vrot.lane.b32.xlu0 %v956_v48, %s1964_s6 }
 0x18a   : > { %v528_v47 = vadd.f32 %v526_v49, %v520_v51  ;;  %v1062_v51 = vmul.f32 %v1061_v44, %v2427_v59 }
 0x18b   : > { %v517_v54 = vpop.permute.xlu1 %516  ;;  %v537_v55 = vpop.permute.xlu0 %536 }
 0x18c   : > { %v521_v58 = vadd.f32 %v517_v54, %v507_v53  ;;  %v542_v62 = vadd.f32 %v537_v55, %v528_v47  ;;  %v2478_v53 = vld [vmem:[#allocation2 + $0x1a] sm:$0xff]  ;;  %v1083_v47 = vstv %s2462_s20  ;;  %s2550_s20 = sld [smem:[#allocation3 + $0x2a]] }
 0x18d   : > { %962 = vrot.lane.b32.xlu1 %v957_v56, %s1964_s6  ;;  %974 = vrot.lane.b32.xlu0 %v970_v57, %s1965_s19  ;;  %v1063_v57 = vmul.f32 %v1061_v44, %v2436_v5 }
 0x18e   : > { %v529_v63 = vadd.f32 %v527_v38, %v521_v58  ;;  %v1084_v38 = vmul.f32 %v1083_v47, %v2478_v53  ;;  %v2487_v58 = vld [vmem:[#allocation2 + $0x22] sm:$0xff] }
 0x18f   : > { %v539_v0 = vpop.permute.xlu1 %538  ;;  %v551_v3 = vpop.permute.xlu0 %550 }
 0x190   : > { %v556_v17 = vadd.f32 %v551_v3, %v542_v62  ;;  %v543_v21 = vadd.f32 %v539_v0, %v529_v63  ;;  %v1085_v0 = vmul.f32 %v1083_v47, %v2487_v58  ;;  %v1098_v3 = vmul.f32 %v1097_v1, %v2478_v53 }
 0x191   : > { %976 = vrot.lane.b32.xlu1 %v971_v4, %s1965_s19  ;;  %996 = vrot.lane.b32.xlu0 %v992_v18, %s1960_s17  ;;  %v1111_v4 = vstv %s2481_s29  ;;  %s2564_s29 = sld [smem:[#allocation3 + $0x4e]] }
 0x193   : > { %v553_v7 = vpop.permute.xlu1 %552  ;;  %v565_v8 = vpop.permute.xlu0 %564 }
 0x194   : > { %v570_v2 = vadd.f32 %v565_v8, %v556_v17  ;;  %v557_v29 = vadd.f32 %v553_v7, %v543_v21  ;;  %v1099_v8 = vmul.f32 %v1097_v1, %v2487_v58  ;;  %v1126_v17 = vmul.f32 %v1125_v11, %v2478_v53 }
 0x195   : > { %998 = vrot.lane.b32.xlu1 %v993_v9, %s1960_s17  ;;  %1010 = vrot.lane.b32.xlu0 %v1006_v10, %s1961_s27  ;;  %v1112_v9 = vmul.f32 %v1111_v4, %v2478_v53 }
 0x197   : > { %v567_v22 = vpop.permute.xlu1 %566  ;;  %v579_v14 = vpop.permute.xlu0 %578 }
 0x198   : > { %v584_v30 = vadd.f32 %v579_v14, %v570_v2  ;;  %v571_v33 = vadd.f32 %v567_v22, %v557_v29  ;;  %v1139_v2 = vstv %s2497_s16  ;;  %s2583_s16 = sld [smem:[#allocation3 + $0x50]] }
 0x199   : > { %1012 = vrot.lane.b32.xlu1 %v1007_v15, %s1961_s27  ;;  %1024 = vrot.lane.b32.xlu0 %v1020_v16, %s1962_s28  ;;  %v1113_v16 = vmul.f32 %v1111_v4, %v2487_v58  ;;  %v1140_v31 = vmul.f32 %v1139_v2, %v2478_v53  ;;  %v1217_v4 = vstv %s2541_s24  ;;  %s2624_s24 = sld [smem:[#allocation3 + $0x56]] }
 0x19b   : > { %v581_v24 = vpop.permute.xlu1 %580  ;;  %v593_v25 = vpop.permute.xlu0 %592 }
 0x19c   : > { %v598_v34 = vadd.f32 %v593_v25, %v584_v30  ;;  %v585_v41 = vadd.f32 %v581_v24, %v571_v33  ;;  %v709_v24 = vstv %s2499_s26  ;;  %v1127_v30 = vmul.f32 %v1125_v11, %v2487_v58  ;;  %s2592_s26 = sld [smem:[#allocation3 + $0x51]] }
 0x19d   : > { %1026 = vrot.lane.b32.xlu1 %v1021_v26, %s1962_s28  ;;  %1038 = vrot.lane.b32.xlu0 %v1034_v28, %s1963_s4  ;;  %v710_v32 = vmul.f32 %v709_v24, %v2272_v20  ;;  %v711_v20 = vmul.f32 %v709_v24, %v2280_v27  ;;  %v1189_v27 = vstv %s2522_s5  ;;  %s2608_s5 = sld [smem:[#allocation3 + $0x53]] }
 0x19f   : > { %v595_v35 = vpop.permute.xlu1 %594  ;;  %v607_v36 = vpop.permute.xlu0 %606 }
 0x1a0   : > { %v612_v43 = vadd.f32 %v607_v36, %v598_v34  ;;  %v599_v45 = vadd.f32 %v595_v35, %v585_v41  ;;  %v1153_v35 = vstv %s2506_s30  ;;  %v1141_v41 = vmul.f32 %v1139_v2, %v2487_v58  ;;  %s2599_s30 = sld [smem:[#allocation3 + $0x52]] }
 0x1a1   : > { %1040 = vrot.lane.b32.xlu1 %v1035_v37, %s1963_s4  ;;  %1052 = vrot.lane.b32.xlu0 %v1048_v39, %s1964_s6 }
 0x1a2   : > { %v620_v46 = vadd.f32 %v618_v40, %v612_v43  ;;  %v1154_v43 = vmul.f32 %v1153_v35, %v2478_v53 }
 0x1a3   : > { %v609_v48 = vpop.permute.xlu1 %608  ;;  %v629_v49 = vpop.permute.xlu0 %628 }
 0x1a4   : > { %v613_v52 = vadd.f32 %v609_v48, %v599_v45  ;;  %v634_v18 = vadd.f32 %v629_v49, %v620_v46  ;;  %v2529_v45 = vld [vmem:[#allocation2 + $0x1b] sm:$0xff]  ;;  %v1175_v46 = vstv %s2513_s3  ;;  %s2603_s3 = sld [smem:[#allocation3 + $0x31]] }
 0x1a5   : > { %1054 = vrot.lane.b32.xlu1 %v1049_v50, %s1964_s6  ;;  %1066 = vrot.lane.b32.xlu0 %v1062_v51, %s1965_s19  ;;  %v1155_v51 = vmul.f32 %v1153_v35, %v2487_v58 }
 0x1a6   : > { %v621_v54 = vadd.f32 %v619_v60, %v613_v52  ;;  %v1176_v60 = vmul.f32 %v1175_v46, %v2529_v45  ;;  %v2538_v52 = vld [vmem:[#allocation2 + $0x23] sm:$0xff] }
 0x1a7   : > { %v631_v55 = vpop.permute.xlu1 %630  ;;  %v643_v56 = vpop.permute.xlu0 %642 }
 0x1a8   : > { %v648_v10 = vadd.f32 %v643_v56, %v634_v18  ;;  %v635_v62 = vadd.f32 %v631_v55, %v621_v54  ;;  %v1177_v55 = vmul.f32 %v1175_v46, %v2538_v52  ;;  %v1190_v56 = vmul.f32 %v1189_v27, %v2529_v45 }
 0x1a9   : > { %1068 = vrot.lane.b32.xlu1 %v1063_v57, %s1965_s19  ;;  %1088 = vrot.lane.b32.xlu0 %v1084_v38, %s1960_s17  ;;  %v1203_v57 = vstv %s2532_s8  ;;  %s2615_s8 = sld [smem:[#allocation3 + $0x55]] }
 0x1ab   : > { %v645_v61 = vpop.permute.xlu1 %644  ;;  %v657_v63 = vpop.permute.xlu0 %656 }
 0x1ac   : > { %v662_v22 = vadd.f32 %v657_v63, %v648_v10  ;;  %v649_v19 = vadd.f32 %v645_v61, %v635_v62  ;;  %v1191_v63 = vmul.f32 %v1189_v27, %v2538_v52  ;;  %v1218_v10 = vmul.f32 %v1217_v4, %v2529_v45 }
 0x1ad   : > { %1090 = vrot.lane.b32.xlu1 %v1085_v0, %s1960_s17  ;;  %1102 = vrot.lane.b32.xlu0 %v1098_v3, %s1961_s27  ;;  %v1204_v0 = vmul.f32 %v1203_v57, %v2529_v45 }
 0x1af   : > { %v659_v42 = vpop.permute.xlu1 %658  ;;  %v671_v7 = vpop.permute.xlu0 %670 }
 0x1b0   : > { %v676_v21 = vadd.f32 %v671_v7, %v662_v22  ;;  %v663_v25 = vadd.f32 %v659_v42, %v649_v19  ;;  %v1231_v22 = vstv %s2548_s25  ;;  %s2634_s25 = sld [smem:[#allocation3 + $0x57]] }
 0x1b1   : > { %1104 = vrot.lane.b32.xlu1 %v1099_v8, %s1961_s27  ;;  %1116 = vrot.lane.b32.xlu0 %v1112_v9, %s1962_s28  ;;  %v1205_v9 = vmul.f32 %v1203_v57, %v2538_v52  ;;  %v1232_v2 = vmul.f32 %v1231_v22, %v2529_v45 }
 0x1b3   : > { %v673_v14 = vpop.permute.xlu1 %672  ;;  %v685_v15 = vpop.permute.xlu0 %684 }
 0x1b4   : > { %v690_v26 = vadd.f32 %v685_v15, %v676_v21  ;;  %v677_v33 = vadd.f32 %v673_v14, %v663_v25  ;;  %v801_v14 = vstv %s2550_s20  ;;  %v1219_v21 = vmul.f32 %v1217_v4, %v2538_v52  ;;  %s2643_s20 = sld [smem:[#allocation3 + $0x58]] }
 0x1b5   : > { %1118 = vrot.lane.b32.xlu1 %v1113_v16, %s1962_s28  ;;  %1130 = vrot.lane.b32.xlu0 %v1126_v17, %s1963_s4  ;;  %v802_v24 = vmul.f32 %v801_v14, %v2325_v12  ;;  %v803_v12 = vmul.f32 %v801_v14, %v2334_v23 }
 0x1b7   : > { %v687_v28 = vpop.permute.xlu1 %686  ;;  %v699_v29 = vpop.permute.xlu0 %698 }
 0x1b8   : > { %v704_v34 = vadd.f32 %v699_v29, %v690_v26  ;;  %v691_v36 = vadd.f32 %v687_v28, %v677_v33  ;;  %v1245_v28 = vstv %s2557_s23  ;;  %v1233_v33 = vmul.f32 %v1231_v22, %v2538_v52  ;;  %s2650_s23 = sld [smem:[#allocation3 + $0x59]] }
 0x1b9   : > { %1132 = vrot.lane.b32.xlu1 %v1127_v30, %s1963_s4  ;;  %1144 = vrot.lane.b32.xlu0 %v1140_v31, %s1964_s6 }
 0x1ba   : > { %v712_v37 = vadd.f32 %v710_v32, %v704_v34  ;;  %v1246_v34 = vmul.f32 %v1245_v28, %v2529_v45 }
 0x1bb   : > { %v701_v39 = vpop.permute.xlu1 %700  ;;  %v721_v40 = vpop.permute.xlu0 %720 }
 0x1bc   : > { %v705_v44 = vadd.f32 %v701_v39, %v691_v36  ;;  %v726_v38 = vadd.f32 %v721_v40, %v712_v37  ;;  %v2580_v37 = vld [vmem:[#allocation2 + $0x1c] sm:$0xff]  ;;  %v1267_v39 = vstv %s2564_s29  ;;  %s2654_s29 = sld [smem:[#allocation3 + $0x38]] }
 0x1bd   : > { %1146 = vrot.lane.b32.xlu1 %v1141_v41, %s1964_s6  ;;  %1158 = vrot.lane.b32.xlu0 %v1154_v43, %s1965_s19  ;;  %v1268_v23 = vmul.f32 %v1267_v39, %v2580_v37 }
 0x1be   : > { %v713_v48 = vadd.f32 %v711_v20, %v705_v44  ;;  %v1247_v20 = vmul.f32 %v1245_v28, %v2538_v52 }
 0x1bf   : > { %v723_v49 = vpop.permute.xlu1 %722  ;;  %v735_v50 = vpop.permute.xlu0 %734 }
 0x1c0   : > { %v740_v3 = vadd.f32 %v735_v50, %v726_v38  ;;  %v727_v18 = vadd.f32 %v723_v49, %v713_v48  ;;  %v2589_v48 = vld [vmem:[#allocation2 + $0x24] sm:$0xff]  ;;  %v1281_v49 = vstv %s2573_s7  ;;  %s2659_s7 = sld [smem:[#allocation3 + $0x5a]] }
 0x1c1   : > { %1160 = vrot.lane.b32.xlu1 %v1155_v51, %s1965_s19  ;;  %1180 = vrot.lane.b32.xlu0 %v1176_v60, %s1960_s17  ;;  %v1269_v60 = vmul.f32 %v1267_v39, %v2589_v48  ;;  %v1282_v27 = vmul.f32 %v1281_v49, %v2580_v37  ;;  %v1283_v38 = vmul.f32 %v1281_v49, %v2589_v48  ;;  %v2640_v39 = vld [vmem:[#allocation2 + $0x25] sm:$0xff]  ;;  %v1387_v49 = vstv %s2634_s25 }
 0x1c3   : > { %v737_v47 = vpop.permute.xlu1 %736  ;;  %v749_v54 = vpop.permute.xlu0 %748 }
 0x1c4   : > { %v754_v42 = vadd.f32 %v749_v54, %v740_v3  ;;  %v741_v11 = vadd.f32 %v737_v47, %v727_v18 }
 0x1c5   : > { %1182 = vrot.lane.b32.xlu1 %v1177_v55, %s1960_s17  ;;  %1194 = vrot.lane.b32.xlu0 %v1190_v56, %s1961_s27  ;;  %v1295_v55 = vstv %s2583_s16  ;;  %s2666_s16 = sld [smem:[#allocation3 + $0x5c]] }
 0x1c6   : > { %v1297_v18 = vmul.f32 %v1295_v55, %v2589_v48 }
 0x1c7   : > { %v751_v1 = vpop.permute.xlu1 %750  ;;  %v763_v61 = vpop.permute.xlu0 %762 }
 0x1c8   : > { %v768_v62 = vadd.f32 %v763_v61, %v754_v42  ;;  %v755_v15 = vadd.f32 %v751_v1, %v741_v11  ;;  %v1296_v1 = vmul.f32 %v1295_v55, %v2580_v37  ;;  %v1401_v55 = vstv %s2643_s20 }
 0x1c9   : > { %1196 = vrot.lane.b32.xlu1 %v1191_v63, %s1961_s27  ;;  %1208 = vrot.lane.b32.xlu0 %v1204_v0, %s1962_s28  ;;  %v1309_v0 = vstv %s2592_s26  ;;  %s2675_s26 = sld [smem:[#allocation3 + $0x5d]] }
 0x1ca   : > { %v1310_v42 = vmul.f32 %v1309_v0, %v2580_v37  ;;  %v1311_v22 = vmul.f32 %v1309_v0, %v2589_v48  ;;  %v985_v0 = vstv %s2654_s29 }
 0x1cb   : > { %v765_v7 = vpop.permute.xlu1 %764  ;;  %v777_v8 = vpop.permute.xlu0 %776 }
 0x1cc   : > { %v782_v16 = vadd.f32 %v777_v8, %v768_v62  ;;  %v769_v25 = vadd.f32 %v765_v7, %v755_v15 }
 0x1cd   : > { %1210 = vrot.lane.b32.xlu1 %v1205_v9, %s1962_s28  ;;  %1222 = vrot.lane.b32.xlu0 %v1218_v10, %s1963_s4  ;;  %v1323_v9 = vstv %s2599_s30  ;;  %v893_v10 = vstv %s2603_s3  ;;  %s2685_s30 = sld [smem:[#allocation3 + $0x5e]] }
 0x1ce   : > { %v1324_v14 = vmul.f32 %v1323_v9, %v2580_v37  ;;  %v895_v28 = vmul.f32 %v893_v10, %v2385_v13  ;;  %s2694_s3 = sld [smem:[#allocation3 + $0x5f]] }
 0x1cf   : > { %v779_v17 = vpop.permute.xlu1 %778  ;;  %v791_v19 = vpop.permute.xlu0 %790 }
 0x1d0   : > { %v796_v26 = vadd.f32 %v791_v19, %v782_v16  ;;  %v783_v29 = vadd.f32 %v779_v17, %v769_v25  ;;  %v894_v16 = vmul.f32 %v893_v10, %v2376_v6  ;;  %v1337_v19 = vstv %s2608_s5  ;;  %s2701_s5 = sld [smem:[#allocation3 + $0x60]] }
 0x1d1   : > { %1224 = vrot.lane.b32.xlu1 %v1219_v21, %s1963_s4  ;;  %1236 = vrot.lane.b32.xlu0 %v1232_v2, %s1964_s6  ;;  %v1325_v25 = vmul.f32 %v1323_v9, %v2589_v48  ;;  %v1429_v10 = vstv %s2659_s7 }
 0x1d2   : > { %v804_v30 = vadd.f32 %v802_v24, %v796_v26  ;;  %v1338_v26 = vmul.f32 %v1337_v19, %v2580_v37 }
 0x1d3   : > { %v793_v31 = vpop.permute.xlu1 %792  ;;  %v813_v32 = vpop.permute.xlu0 %812 }
 0x1d4   : > { %v797_v35 = vadd.f32 %v793_v31, %v783_v29  ;;  %v818_v36 = vadd.f32 %v813_v32, %v804_v30  ;;  %v2631_v30 = vld [vmem:[#allocation2 + $0x1d] sm:$0xff]  ;;  %v1359_v31 = vstv %s2615_s8  ;;  %s2705_s8 = sld [smem:[#allocation3 + $0x3f]] }
 0x1d5   : > { %1238 = vrot.lane.b32.xlu1 %v1233_v33, %s1964_s6  ;;  %1250 = vrot.lane.b32.xlu0 %v1246_v34, %s1965_s19  ;;  %v1360_v13 = vmul.f32 %v1359_v31, %v2631_v30 }
 0x1d6   : > { %v805_v40 = vadd.f32 %v803_v12, %v797_v35  ;;  %v1339_v12 = vmul.f32 %v1337_v19, %v2589_v48  ;;  %v2682_v19 = vld [vmem:[#allocation2 + $0x1e] sm:$0xff] }
 0x1d7   : > { %v815_v41 = vpop.permute.xlu1 %814  ;;  %v827_v43 = vpop.permute.xlu0 %826 }
 0x1d8   : > { %v819_v44 = vadd.f32 %v815_v41, %v805_v40  ;;  %v832_v46 = vadd.f32 %v827_v43, %v818_v36  ;;  %v1373_v40 = vstv %s2624_s24  ;;  %s2710_s24 = sld [smem:[#allocation3 + $0x61]] }
 0x1d9   : > { %1252 = vrot.lane.b32.xlu1 %v1247_v20, %s1965_s19  ;;  %1272 = vrot.lane.b32.xlu0 %v1268_v23, %s1960_s17  ;;  %v1361_v20 = vmul.f32 %v1359_v31, %v2640_v39  ;;  %v1374_v23 = vmul.f32 %v1373_v40, %v2631_v30 }
 0x1db   : > { %v829_v50 = vpop.permute.xlu1 %828  ;;  %v841_v51 = vpop.permute.xlu0 %840 }
 0x1dc   : > { %v833_v47 = vadd.f32 %v829_v50, %v819_v44  ;;  %v846_v54 = vadd.f32 %v841_v51, %v832_v46 }
 0x1dd   : > { %1274 = vrot.lane.b32.xlu1 %v1269_v60, %s1960_s17  ;;  %1286 = vrot.lane.b32.xlu0 %v1282_v27, %s1961_s27  ;;  %v1375_v60 = vmul.f32 %v1373_v40, %v2640_v39  ;;  %v1388_v27 = vmul.f32 %v1387_v49, %v2631_v30 }
 0x1df   : > { %v843_v56 = vpop.permute.xlu1 %842  ;;  %v855_v57 = vpop.permute.xlu0 %854 }
 0x1e0   : > { %v847_v61 = vadd.f32 %v843_v56, %v833_v47  ;;  %v860_v63 = vadd.f32 %v855_v57, %v846_v54 }
 0x1e1   : > { %1288 = vrot.lane.b32.xlu1 %v1283_v38, %s1961_s27  ;;  %1300 = vrot.lane.b32.xlu0 %v1296_v1, %s1962_s28  ;;  %v1389_v38 = vmul.f32 %v1387_v49, %v2640_v39  ;;  %v1402_v1 = vmul.f32 %v1401_v55, %v2631_v30 }
 0x1e3   : > { %v857_v3 = vpop.permute.xlu1 %856  ;;  %v869_v4 = vpop.permute.xlu0 %868 }
 0x1e4   : > { %v861_v7 = vadd.f32 %v857_v3, %v847_v61  ;;  %v874_v8 = vadd.f32 %v869_v4, %v860_v63  ;;  %v1415_v63 = vstv %s2650_s23 }
 0x1e5   : > { %1302 = vrot.lane.b32.xlu1 %v1297_v18, %s1962_s28  ;;  %1314 = vrot.lane.b32.xlu0 %v1310_v42, %s1963_s4  ;;  %v1403_v42 = vmul.f32 %v1401_v55, %v2640_v39 }
 0x1e7   : > { %v871_v11 = vpop.permute.xlu1 %870  ;;  %v883_v62 = vpop.permute.xlu0 %882 }
 0x1e8   : > { %v875_v15 = vadd.f32 %v871_v11, %v861_v7  ;;  %v888_v17 = vadd.f32 %v883_v62, %v874_v8  ;;  %v1416_v7 = vmul.f32 %v1415_v63, %v2631_v30  ;;  %v986_v8 = vmul.f32 %v985_v0, %v2427_v59 }
 0x1e9   : > { %1316 = vrot.lane.b32.xlu1 %v1311_v22, %s1963_s4  ;;  %1328 = vrot.lane.b32.xlu0 %v1324_v14, %s1964_s6 }
 0x1ea   : > { %v896_v21 = vadd.f32 %v894_v16, %v888_v17  ;;  %v1430_v16 = vmul.f32 %v1429_v10, %v2631_v30  ;;  %v987_v17 = vmul.f32 %v985_v0, %v2436_v5  ;;  %v1465_v5 = vstv %s2675_s26  ;;  %s1966_s26 = smov [#allocation8]  }
 0x1eb   : > { %v885_v2 = vpop.permute.xlu1 %884  ;;  %v905_v24 = vpop.permute.xlu0 %904 }
 0x1ec   : > { %v889_v29 = vadd.f32 %v885_v2, %v875_v15  ;;  %v910_v6 = vadd.f32 %v905_v24, %v896_v21  ;;  %v1417_v15 = vmul.f32 %v1415_v63, %v2640_v39  ;;  %v1451_v21 = vstv %s2666_s16  ;;  %s1549_s16 = scalar_lea.sflag [#allocation5], %s2108_s14 }
 0x1ed   : > { %1330 = vrot.lane.b32.xlu1 %v1325_v25, %s1964_s6  ;;  %1342 = vrot.lane.b32.xlu0 %v1338_v26, %s1965_s19  ;;  %v1431_v26 = vmul.f32 %v1429_v10, %v2640_v39 }
 0x1ee   : > { %v897_v32 = vadd.f32 %v895_v28, %v889_v29  ;;  %v1452_v28 = vmul.f32 %v1451_v21, %v2682_v19  ;;  %v2691_v29 = vld [vmem:[#allocation2 + $0x26] sm:$0xff] }
 0x1ef   : > { %v907_v33 = vpop.permute.xlu1 %906  ;;  %v919_v34 = vpop.permute.xlu0 %918 }
 0x1f0   : > { %v911_v35 = vadd.f32 %v907_v33, %v897_v32  ;;  %v924_v36 = vadd.f32 %v919_v34, %v910_v6  ;;  %v1453_v32 = vmul.f32 %v1451_v21, %v2691_v29  ;;  %v1466_v33 = vmul.f32 %v1465_v5, %v2682_v19 }
 0x1f1   : > { %1344 = vrot.lane.b32.xlu1 %v1339_v12, %s1965_s19  ;;  %1364 = vrot.lane.b32.xlu0 %v1360_v13, %s1960_s17  ;;  %v1479_v34 = vstv %s2685_s30  ;;  %s1888_s30 = sshll.u32 %s1966_s26, 4  ;;  %s1889_s30 = int_to_ptr.vmem [resolvable:$false] %s1888_s30 }
 0x1f2   : > { %v1480_v40 = vmul.f32 %v1479_v34, %v2682_v19  ;;  %v1481_v49 = vmul.f32 %v1479_v34, %v2691_v29 }
 0x1f3   : > { %v921_v41 = vpop.permute.xlu1 %920  ;;  %v933_v43 = vpop.permute.xlu0 %932 }
 0x1f4   : > { %v925_v44 = vadd.f32 %v921_v41, %v911_v35  ;;  %v938_v46 = vadd.f32 %v933_v43, %v924_v36  ;;  %v1467_v36 = vmul.f32 %v1465_v5, %v2691_v29  ;;  %v1493_v43 = vstv %s2694_s3  ;;  %s1890_s3 = scalar_lea.vmem %s1889_s30, 512 }
 0x1f5   : > { %1366 = vrot.lane.b32.xlu1 %v1361_v20, %s1960_s17  ;;  %1378 = vrot.lane.b32.xlu0 %v1374_v23, %s1961_s27 }
 0x1f7   : > { %v935_v50 = vpop.permute.xlu1 %934  ;;  %v947_v51 = vpop.permute.xlu0 %946 }
 0x1f8   : > { %v939_v47 = vadd.f32 %v935_v50, %v925_v44  ;;  %v952_v54 = vadd.f32 %v947_v51, %v938_v46  ;;  %v1494_v50 = vmul.f32 %v1493_v43, %v2682_v19 }
 0x1f9   : > { %1380 = vrot.lane.b32.xlu1 %v1375_v60, %s1961_s27  ;;  %1392 = vrot.lane.b32.xlu0 %v1388_v27, %s1962_s28  ;;  %v1507_v27 = vstv %s2701_s5 }
 0x1fb   : > { %v949_v56 = vpop.permute.xlu1 %948  ;;  %v961_v57 = vpop.permute.xlu0 %960 }
 0x1fc   : > { %v953_v61 = vadd.f32 %v949_v56, %v939_v47  ;;  %v966_v3 = vadd.f32 %v961_v57, %v952_v54  ;;  %v1077_v47 = vstv %s2705_s8 }
 0x1fd   : > { %1394 = vrot.lane.b32.xlu1 %v1389_v38, %s1962_s28  ;;  %1406 = vrot.lane.b32.xlu0 %v1402_v1, %s1963_s4  ;;  %v1495_v38 = vmul.f32 %v1493_v43, %v2691_v29  ;;  %v1508_v1 = vmul.f32 %v1507_v27, %v2682_v19  ;;  %v1078_v63 = vmul.f32 %v1077_v47, %v2478_v53 }
 0x1fe   : > { %v1079_v10 = vmul.f32 %v1077_v47, %v2487_v58 }
 0x1ff   : > { %v963_v4 = vpop.permute.xlu1 %962  ;;  %v975_v18 = vpop.permute.xlu0 %974 }
 0x200   : > { %v980_v9 = vadd.f32 %v975_v18, %v966_v3  ;;  %v967_v11 = vadd.f32 %v963_v4, %v953_v61  ;;  %v1521_v3 = vstv %s2710_s24 }
 0x201   : > { %1408 = vrot.lane.b32.xlu1 %v1403_v42, %s1963_s4  ;;  %1420 = vrot.lane.b32.xlu0 %v1416_v7, %s1964_s6 }
 0x202   : > { %v988_v62 = vadd.f32 %v986_v8, %v980_v9  ;;  %v1509_v8 = vmul.f32 %v1507_v27, %v2691_v29  ;;  %v1522_v9 = vmul.f32 %v1521_v3, %v2682_v19 }
 0x203   : > { %v977_v22 = vpop.permute.xlu1 %976  ;;  %v997_v14 = vpop.permute.xlu0 %996 }
 0x204   : > { %v981_v59 = vadd.f32 %v977_v22, %v967_v11  ;;  %v1002_v12 = vadd.f32 %v997_v14, %v988_v62  ;;  %v1523_v14 = vmul.f32 %v1521_v3, %v2691_v29 }
 0x205   : > { %1422 = vrot.lane.b32.xlu1 %v1417_v15, %s1964_s6  ;;  %1434 = vrot.lane.b32.xlu0 %v1430_v16, %s1965_s19 }
 0x206   : > { %v989_v2 = vadd.f32 %v987_v17, %v981_v59 }
 0x207   : > { %v999_v24 = vpop.permute.xlu1 %998  ;;  %v1011_v25 = vpop.permute.xlu0 %1010 }
 0x208   : > { %v1016_v41 = vadd.f32 %v1011_v25, %v1002_v12  ;;  %v1003_v20 = vadd.f32 %v999_v24, %v989_v2 }
 0x209   : > { %1436 = vrot.lane.b32.xlu1 %v1431_v26, %s1965_s19  ;;  %1456 = vrot.lane.b32.xlu0 %v1452_v28, %s1960_s17 }
 0x20b   : > { %v1013_v6 = vpop.permute.xlu1 %1012  ;;  %v1025_v31 = vpop.permute.xlu0 %1024 }
 0x20c   : > { %v1030_v23 = vadd.f32 %v1025_v31, %v1016_v41  ;;  %v1017_v51 = vadd.f32 %v1013_v6, %v1003_v20 }
 0x20d   : > { %1458 = vrot.lane.b32.xlu1 %v1453_v32, %s1960_s17  ;;  %1470 = vrot.lane.b32.xlu0 %v1466_v33, %s1961_s27  ;;  %s1727_s17 = sld [smem:[#allocation3 + $0x46]] }
 0x20f   : > { %v1027_v13 = vpop.permute.xlu1 %1026  ;;  %v1039_v35 = vpop.permute.xlu0 %1038 }
 0x210   : > { %v1044_v60 = vadd.f32 %v1039_v35, %v1030_v23  ;;  %v1031_v54 = vadd.f32 %v1027_v13, %v1017_v51 }
 0x211   : > { %1472 = vrot.lane.b32.xlu1 %v1467_v36, %s1961_s27  ;;  %1484 = vrot.lane.b32.xlu0 %v1480_v40, %s1962_s28  ;;  %s1734_s27 = sld [smem:[#allocation3 + $0x4d]] }
 0x213   : > { %v1041_v44 = vpop.permute.xlu1 %1040  ;;  %v1053_v46 = vpop.permute.xlu0 %1052  ;;  %v1169_v6 = vstv %s1727_s17 }
 0x214   : > { %v1058_v55 = vadd.f32 %v1053_v46, %v1044_v60  ;;  %v1045_v61 = vadd.f32 %v1041_v44, %v1031_v54  ;;  %v1170_v35 = vmul.f32 %v1169_v6, %v2529_v45  ;;  %v1171_v23 = vmul.f32 %v1169_v6, %v2538_v52 }
 0x215   : > { %1486 = vrot.lane.b32.xlu1 %v1481_v49, %s1962_s28  ;;  %1498 = vrot.lane.b32.xlu0 %v1494_v50, %s1963_s4  ;;  %s1741_s28 = sld [smem:[#allocation3 + $0x54]] }
 0x217   : > { %v1055_v56 = vpop.permute.xlu1 %1054  ;;  %v1067_v57 = vpop.permute.xlu0 %1066 }
 0x218   : > { %v1072_v0 = vadd.f32 %v1067_v57, %v1058_v55  ;;  %v1059_v4 = vadd.f32 %v1055_v56, %v1045_v61  ;;  %v1261_v61 = vstv %s1734_s27 }
 0x219   : > { %1500 = vrot.lane.b32.xlu1 %v1495_v38, %s1963_s4  ;;  %1512 = vrot.lane.b32.xlu0 %v1508_v1, %s1964_s6  ;;  %s1748_s4 = sld [smem:[#allocation3 + $0x5b]] }
 0x21a   : > { %v1080_v18 = vadd.f32 %v1078_v63, %v1072_v0 }
 0x21b   : > { %v1069_v42 = vpop.permute.xlu1 %1068  ;;  %v1089_v7 = vpop.permute.xlu0 %1088 }
 0x21c   : > { %v1073_v11 = vadd.f32 %v1069_v42, %v1059_v4  ;;  %v1094_v17 = vadd.f32 %v1089_v7, %v1080_v18  ;;  %v1262_v42 = vmul.f32 %v1261_v61, %v2580_v37 }
 0x21d   : > { %1514 = vrot.lane.b32.xlu1 %v1509_v8, %s1964_s6  ;;  %1526 = vrot.lane.b32.xlu0 %v1522_v9, %s1965_s19  ;;  %s1657_s6 = sshll.u32 %s2108_s14, 4 }
 0x21e   : > { %v1081_v53 = vadd.f32 %v1079_v10, %v1073_v11  ;;  %s175_s25 = scalar_lea.vmem [#allocation8], %s1657_s6 }
 0x21f   : > { %v1091_v62 = vpop.permute.xlu1 %1090  ;;  %v1103_v22 = vpop.permute.xlu0 %1102  ;;  %s1562_s20 = sshll.u32 %s175_s25, 4  ;;  %s2749_s20 = int_to_ptr.vmem [resolvable:$true] %s1562_s20 }
 0x220   : > { %v1108_v2 = vadd.f32 %v1103_v22, %v1094_v17  ;;  %v1095_v58 = vadd.f32 %v1091_v62, %v1081_v53  ;;  %v1263_v53 = vmul.f32 %v1261_v61, %v2589_v48  ;;  %p1891_p8 = scmp.lt.s32.totalorder %s2749_s20, %s1889_s30 }
 0x221   : > { %1528 = vrot.lane.b32.xlu1 %v1523_v14, %s1965_s19  ;;  %s1763_s19 = sshll.u32 %s2005_s13, 8  ;;  %s1884_s13 = scalar_lea.vmem %s2749_s20, 256 }
 0x222   : > { %s2747_s7 = scalar_lea.hbm %s2795_s2, %s1763_s19  ;;  %p1885_p13 = scmp.ne.s32.totalorder %s2749_s20, %s1884_s13 }
 0x223   : > { %v1105_v15 = vpop.permute.xlu1 %1104  ;;  %v1117_v16 = vpop.permute.xlu0 %1116  ;;  %p1892_p9 = scmp.lt.s32.totalorder %s1890_s3, %s1884_s13 }
 0x224   : > { %v1122_v24 = vadd.f32 %v1117_v16, %v1108_v2  ;;  %v1109_v28 = vadd.f32 %v1105_v15, %v1095_v58  ;;  %p1886_p2 = pnand %p1885_p13, %p2811_p3 }
 0x225   : > { %p1893_p10 = por %p1892_p9, %p1891_p8 }
 0x226   : > { %p1887_p7 = pneg %p1886_p2 }
 0x227   : > { %v1119_v59 = vpop.permute.xlu1 %1118  ;;  %v1131_v21 = vpop.permute.xlu0 %1130 }
 0x228   : > { %v1136_v5 = vadd.f32 %v1131_v21, %v1122_v24  ;;  %v1123_v31 = vadd.f32 %v1119_v59, %v1109_v28  ;;  %p1894_p1 = pnand %p1893_p10, %p1887_p7 }
 0x22b   : > { %v1133_v25 = vpop.permute.xlu1 %1132  ;;  %v1145_v26 = vpop.permute.xlu0 %1144 }
 0x22c   : > { %v1150_v32 = vadd.f32 %v1145_v26, %v1136_v5  ;;  %v1137_v12 = vadd.f32 %v1133_v25, %v1123_v31  ;;  %v1353_v5 = vstv %s1741_s28 }
 0x22f   : > { %v1147_v33 = vpop.permute.xlu1 %1146  ;;  %v1159_v34 = vpop.permute.xlu0 %1158 }
 0x230   : > { %v1164_v13 = vadd.f32 %v1159_v34, %v1150_v32  ;;  %v1151_v36 = vadd.f32 %v1147_v33, %v1137_v12  ;;  %v1354_v12 = vmul.f32 %v1353_v5, %v2631_v30 }
 0x232   : > { %v1172_v40 = vadd.f32 %v1170_v35, %v1164_v13 }
 0x233   : > { %v1161_v41 = vpop.permute.xlu1 %1160  ;;  %v1181_v43 = vpop.permute.xlu0 %1180 }
 0x234   : > { %v1165_v20 = vadd.f32 %v1161_v41, %v1151_v36  ;;  %v1186_v60 = vadd.f32 %v1181_v43, %v1172_v40  ;;  %v1355_v43 = vmul.f32 %v1353_v5, %v2640_v39 }
 0x236   : > { %v1173_v44 = vadd.f32 %v1171_v23, %v1165_v20 }
 0x237   : > { %v1183_v46 = vpop.permute.xlu1 %1182  ;;  %v1195_v49 = vpop.permute.xlu0 %1194 }
 0x238   : > { %v1200_v54 = vadd.f32 %v1195_v49, %v1186_v60  ;;  %v1187_v55 = vadd.f32 %v1183_v46, %v1173_v44 }
 0x23b   : > { %v1197_v50 = vpop.permute.xlu1 %1196  ;;  %v1209_v51 = vpop.permute.xlu0 %1208 }
 0x23c   : > { %v1214_v56 = vadd.f32 %v1209_v51, %v1200_v54  ;;  %v1201_v38 = vadd.f32 %v1197_v50, %v1187_v55 }
 0x23f   : > { %v1211_v27 = vpop.permute.xlu1 %1210  ;;  %v1223_v47 = vpop.permute.xlu0 %1222 }
 0x240   : > { %v1228_v1 = vadd.f32 %v1223_v47, %v1214_v56  ;;  %v1215_v63 = vadd.f32 %v1211_v27, %v1201_v38 }
 0x243   : > { %v1225_v45 = vpop.permute.xlu1 %1224  ;;  %v1237_v57 = vpop.permute.xlu0 %1236 }
 0x244   : > { %v1242_v0 = vadd.f32 %v1237_v57, %v1228_v1  ;;  %v1229_v4 = vadd.f32 %v1225_v45, %v1215_v63  ;;  %v1445_v57 = vstv %s1748_s4 }
 0x247   : > { %v1239_v52 = vpop.permute.xlu1 %1238  ;;  %v1251_v3 = vpop.permute.xlu0 %1250 }
 0x248   : > { %v1256_v18 = vadd.f32 %v1251_v3, %v1242_v0  ;;  %v1243_v7 = vadd.f32 %v1239_v52, %v1229_v4  ;;  %v1446_v52 = vmul.f32 %v1445_v57, %v2682_v19 }
 0x24a   : > { %v1264_v8 = vadd.f32 %v1262_v42, %v1256_v18 }
 0x24b   : > { %v1253_v9 = vpop.permute.xlu1 %1252  ;;  %v1273_v10 = vpop.permute.xlu0 %1272 }
 0x24c   : > { %v1257_v11 = vadd.f32 %v1253_v9, %v1243_v7  ;;  %v1278_v17 = vadd.f32 %v1273_v10, %v1264_v8  ;;  %v1447_v8 = vmul.f32 %v1445_v57, %v2691_v29 }
 0x24e   : > { %v1265_v62 = vadd.f32 %v1263_v53, %v1257_v11 }
 0x24f   : > { %v1275_v22 = vpop.permute.xlu1 %1274  ;;  %v1287_v14 = vpop.permute.xlu0 %1286 }
 0x250   : > { %v1292_v2 = vadd.f32 %v1287_v14, %v1278_v17  ;;  %v1279_v58 = vadd.f32 %v1275_v22, %v1265_v62 }
 0x253   : > { %v1289_v15 = vpop.permute.xlu1 %1288  ;;  %v1301_v16 = vpop.permute.xlu0 %1300 }
 0x254   : > { %v1306_v24 = vadd.f32 %v1301_v16, %v1292_v2  ;;  %v1293_v26 = vadd.f32 %v1289_v15, %v1279_v58 }
 0x257   : > { %v1303_v59 = vpop.permute.xlu1 %1302  ;;  %v1315_v21 = vpop.permute.xlu0 %1314 }
 0x258   : > { %v1320_v28 = vadd.f32 %v1315_v21, %v1306_v24  ;;  %v1307_v6 = vadd.f32 %v1303_v59, %v1293_v26 }
 0x25b   : > { %v1317_v37 = vpop.permute.xlu1 %1316  ;;  %v1329_v25 = vpop.permute.xlu0 %1328 }
 0x25c   : > { %v1334_v31 = vadd.f32 %v1329_v25, %v1320_v28  ;;  %v1321_v33 = vadd.f32 %v1317_v37, %v1307_v6 }
 0x25f   : > { %v1331_v48 = vpop.permute.xlu1 %1330  ;;  %v1343_v32 = vpop.permute.xlu0 %1342 }
 0x260   : > { %v1348_v34 = vadd.f32 %v1343_v32, %v1334_v31  ;;  %v1335_v13 = vadd.f32 %v1331_v48, %v1321_v33 }
 0x262   : > { %v1356_v35 = vadd.f32 %v1354_v12, %v1348_v34 }
 0x263   : > { %v1345_v36 = vpop.permute.xlu1 %1344  ;;  %v1365_v40 = vpop.permute.xlu0 %1364 }
 0x264   : > { %v1349_v41 = vadd.f32 %v1345_v36, %v1335_v13  ;;  %v1370_v50 = vadd.f32 %v1365_v40, %v1356_v35 }
 0x266   : > { %v1357_v20 = vadd.f32 %v1355_v43, %v1349_v41 }
 0x267   : > { %v1367_v23 = vpop.permute.xlu1 %1366  ;;  %v1379_v44 = vpop.permute.xlu0 %1378 }
 0x268   : > { %v1384_v27 = vadd.f32 %v1379_v44, %v1370_v50  ;;  %v1371_v47 = vadd.f32 %v1367_v23, %v1357_v20 }
 0x26b   : > { %v1381_v46 = vpop.permute.xlu1 %1380  ;;  %v1393_v49 = vpop.permute.xlu0 %1392 }
 0x26c   : > { %v1398_v54 = vadd.f32 %v1393_v49, %v1384_v27  ;;  %v1385_v56 = vadd.f32 %v1381_v46, %v1371_v47 }
 0x26f   : > { %v1395_v51 = vpop.permute.xlu1 %1394  ;;  %v1407_v60 = vpop.permute.xlu0 %1406 }
 0x270   : > { %v1412_v45 = vadd.f32 %v1407_v60, %v1398_v54  ;;  %v1399_v38 = vadd.f32 %v1395_v51, %v1385_v56 }
 0x273   : > { %v1409_v30 = vpop.permute.xlu1 %1408  ;;  %v1421_v55 = vpop.permute.xlu0 %1420 }
 0x274   : > { %v1426_v1 = vadd.f32 %v1421_v55, %v1412_v45  ;;  %v1413_v63 = vadd.f32 %v1409_v30, %v1399_v38 }
 0x277   : > { %v1423_v39 = vpop.permute.xlu1 %1422  ;;  %v1435_v61 = vpop.permute.xlu0 %1434 }
 0x278   : > { %v1440_v0 = vadd.f32 %v1435_v61, %v1426_v1  ;;  %v1427_v3 = vadd.f32 %v1423_v39, %v1413_v63 }
 0x27a   : > { %v1448_v4 = vadd.f32 %v1446_v52, %v1440_v0 }
 0x27b   : > { %v1437_v18 = vpop.permute.xlu1 %1436  ;;  %v1457_v42 = vpop.permute.xlu0 %1456 }
 0x27c   : > { %v1441_v7 = vadd.f32 %v1437_v18, %v1427_v3  ;;  %v1462_v22 = vadd.f32 %v1457_v42, %v1448_v4 }
 0x27e   : > { %v1449_v9 = vadd.f32 %v1447_v8, %v1441_v7 }
 0x27f   : > { %v1459_v10 = vpop.permute.xlu1 %1458  ;;  %v1471_v11 = vpop.permute.xlu0 %1470 }
 0x280   : > { %v1476_v16 = vadd.f32 %v1471_v11, %v1462_v22  ;;  %v1463_v17 = vadd.f32 %v1459_v10, %v1449_v9 }
 0x283   : > { %v1473_v53 = vpop.permute.xlu1 %1472  ;;  %v1485_v62 = vpop.permute.xlu0 %1484 }
 0x284   : > { %v1490_v59 = vadd.f32 %v1485_v62, %v1476_v16  ;;  %v1477_v2 = vadd.f32 %v1473_v53, %v1463_v17 }
 0x287   : > { %v1487_v14 = vpop.permute.xlu1 %1486  ;;  %v1499_v15 = vpop.permute.xlu0 %1498 }
 0x288   : > { %v1504_v58 = vadd.f32 %v1499_v15, %v1490_v59  ;;  %v1491_v24 = vadd.f32 %v1487_v14, %v1477_v2 }
 0x28b   : > { %v1501_v21 = vpop.permute.xlu1 %1500  ;;  %v1513_v19 = vpop.permute.xlu0 %1512 }
 0x28c   : > { %v1518_v37 = vadd.f32 %v1513_v19, %v1504_v58  ;;  %v1505_v29 = vadd.f32 %v1501_v21, %v1491_v24 }
 0x28f   : > { %v1515_v25 = vpop.permute.xlu1 %1514  ;;  %v1527_v26 = vpop.permute.xlu0 %1526 }
 0x290   : > { %v1532_v28 = vadd.f32 %v1527_v26, %v1518_v37  ;;  %v1519_v5 = vadd.f32 %v1515_v25, %v1505_v29 }
 0x292   : > { %v1755_v6 = vmul.f32 -1.442695, %v1532_v28 }
 0x293   : > { %v1529_v31 = vpop.permute.xlu1 %1528 }
 0x294   : > { %1833 = vpow2.f32 %v1755_v6  ;;  %v1533_v48 = vadd.f32 %v1529_v31, %v1519_v5 }
 0x296   : > { %v1756_v32 = vmul.f32 -1.442695, %v1533_v48 }
 0x298   : > { %1835 = vpow2.f32 %v1756_v32 }
 0x2a1   : > { %v1834_v33 = vpop.eup %1833 }
 0x2a2   : > { %v1540_v34 = vadd.f32 1.0, %v1834_v33 }
 0x2a4   : > { %1837 = vrcp.f32 %v1540_v34 }
 0x2a5   : > { %v1836_v12 = vpop.eup %1835 }
 0x2a6   : > { %v1541_v13 = vadd.f32 1.0, %v1836_v12 }
 0x2a8   : > { %1839 = vrcp.f32 %v1541_v13 }
 0x2b1   : > { %v1838_v35 = vpop.eup %1837 }
 0x2b2   : > { %1546 = vst.msk [vmem:[%s175_s25] sm:$0xff] %vm192_vm0, %v1838_v35 }
 0x2b5   : > { %v1840_v36 = vpop.eup %1839 }
 0x2b6   : > { %1547 = vst.msk [vmem:[%s175_s25 + $0x8] sm:$0xff] %vm192_vm0, %v1840_v36 }
 0x2b7   : > { %1897 = shalt.err (!%p1894_p1)
}
 0x2b8   : > { %s1898_s5 = scalar_lea.hbm %s2747_s7, 256  ;;  %s1902_s17 = scalar_lea.hbm %s2795_s2, 512 }
 0x2b9   : > { %p1899_p4 = scmp.ne.s32.totalorder %s2747_s7, %s1898_s5  ;;  %p1903_p12 = scmp.lt.s32.totalorder %s2747_s7, %s2795_s2 }
 0x2ba   : > { %p1904_p0 = scmp.lt.s32.totalorder %s1902_s17, %s1898_s5 }
 0x2bb   : > { %p1900_p11 = pnand %p1899_p4, %p2811_p3 }
 0x2bc   : > { %p1905_p6 = por %p1904_p0, %p1903_p12 }
 0x2bd   : > { %p1901_p5 = pneg %p1900_p11 }
 0x2bf   : > { %p1906_p13 = pnand %p1905_p6, %p1901_p5 }
 0x2c1   : > { %1909 = shalt.err (!%p1906_p13)
}
 0x2c2   : > { %s1967_s4 = smov 128   ;;  %s1968_s6 = smov 8  }
 0x2c3   : > { %1770 = dma.vmem_to_hbm [thread:$0]  (%p2811_p3), %s2749_s20, 256, %s2747_s7, %s1549_s16, %s1967_s4, %s1967_s4, %s1968_s6  }
 0x2c4 PF: > { %s1577_s19 = sand.u32 1, %s1940_s9   ;;  %p2812_p2 = scmp.ne.s32.totalorder %s2803_s22, 0 }
 0x2c5   : > { %p2813_p7 = scmp.ge.s32.totalorder %s1952_s12, 2  ;;  %s1578_s25 = scalar_lea.sflag [#allocation5], %s1577_s19 }
 0x2c7   : > { %p1781_p8 = pnand %p2813_p7, %p2812_p2 }
 0x2c9   : > { %p1782_p9 = pneg %p1781_p8 }
 0x2cb   : > { %1935 = dma.done.wait (%p1782_p9), %s1578_s25, 256  }
 0x2cc   : > { %1937 = vsyncadd (%p1782_p9), %s1578_s25, 4294967040  ;;  %p16_p10 = scmp.ge.s32.totalorder %s2009_s15, 4   ;;  %s2814_s9 = smov %s1944_s10 }
 0x2cd   : > { %s2815_s10 = smov %s1948_s11  ;;  %s2816_s11 = smov %s2021_s18 }
 0x2ce   : > { %s2817_s12 = smov %s2009_s15  ;;  %18 = sbr.rel (!%p16_p10) target bundleno = 6 (0x6), region = 79 }
 0x2d3   :  { %1583 = vsyncpa [#allocation4], 1 }
 0x2d4   :  { %1585 = vsyncpa [#allocation4 + $0x1], 1 }
 0x2d5   :  { %1586 = vsyncpa [#allocation5], 1 }
 0x2d6   :  { %1588 = vsyncpa [#allocation5 + $0x1], 1 }
 0x2d7   :  { %1589 = vsyncpa [#allocation6], 1 }
 0x2d8   :  { %1591 = vsyncpa [#allocation6 + $0x1], 1 }

</bundles_post_ra>
